<compile_context>
chip_gen: v7x
topology: tpu7x:2x2x1
jax: 0.10.0
libtpu: 0.0.40
codegen_flags: <defaults>
</compile_context>

<pallas_src>
import functools

import jax
import jax.numpy as jnp
from jax.experimental import pallas as pl
from jax.experimental.pallas import tpu as pltpu


def _round_up(a, m):
    return ((a + m - 1) // m) * m


def _group_norm_kernel(x_ref, gmat_ref, gmat_t_ref, w_ref, b_ref, o_ref, *,
                       cg, eps):
    # x_ref: (TR, C') block, gmat: (C', G') one-hot channel->group, gmat_t: (G', C')
    x = x_ref[...].astype(jnp.float32)
    gmat = gmat_ref[...]
    gmat_t = gmat_t_ref[...]
    hi = jax.lax.Precision.HIGHEST

    # group sums -> per-channel broadcast of the group mean (small matmuls keep
    # every tensor lane-dense; accumulation stays f32-accurate via HIGHEST).
    gsum = jnp.dot(x, gmat, preferred_element_type=jnp.float32, precision=hi)
    mean_c = jnp.dot(gsum * (1.0 / cg), gmat_t,
                     preferred_element_type=jnp.float32, precision=hi)
    d = x - mean_c
    # unbiased variance (torch .var default divides by N-1), two-pass form.
    var_g = jnp.dot(d * d, gmat, preferred_element_type=jnp.float32,
                    precision=hi) * (1.0 / (cg - 1))
    var_c = jnp.dot(var_g, gmat_t, preferred_element_type=jnp.float32,
                    precision=hi)
    xn = d * jax.lax.rsqrt(var_c + eps)
    o_ref[...] = (xn * w_ref[...] + b_ref[...]).astype(o_ref.dtype)


def _auto_row_tile(rows, c_eff, in_bytes, out_bytes):
    # Budget ~20 MiB of the 32 MiB scoped VMEM for the streaming buffers:
    # double-buffered input + output, plus a few f32-sized block temporaries.
    budget = 20 * 1024 * 1024
    per_row = c_eff * (2 * in_bytes + 2 * out_bytes + 3 * 4)
    tile = min(1024, max(16, budget // max(per_row, 1)))
    tile -= tile % 16                      # sublane friendly (incl. packed bf16)
    # Keep >= 2 grid steps when possible so v7x can shard the "parallel" axis
    # across both TensorCores.
    while tile > 16 and pl.cdiv(rows, tile) < 2:
        tile = max(16, tile // 2)
    return max(16, tile)


def group_norm(x, weight=None, bias=None, *, num_groups, eps=1e-8,
               domain_wise=False, row_tile=None):
    """Channels-last GroupNorm forward matching the PyTorch module."""
    if domain_wise:
        # TODO(synk): domain_wise=True needs a per-(batch, group) reduction over
        # all spatial positions (cross-row accumulator kernel); not implemented.
        raise NotImplementedError("domain_wise=True is not implemented")

    *lead, c = x.shape
    assert c % num_groups == 0, "num_channels must be divisible by num_groups"
    cg = c // num_groups
    assert cg > 1, "unbiased variance needs >1 channel per group"

    if weight is None:
        weight = jnp.ones((c,), x.dtype)
    if bias is None:
        bias = jnp.zeros((c,), x.dtype)

    rows = 1
    for dim in lead:
        rows *= dim

    # Lane-dense repack: fold rows together while C' < 128 (free reshape).
    # Groups stay contiguous inside each packed row; this only multiplies the
    # number of groups per kernel row.
    pack = 1
    while c * pack < 128 and rows % (pack * 2) == 0:
        pack *= 2
    rows_eff = rows // pack
    c_eff = c * pack
    g_eff = num_groups * pack

    x2 = x.reshape(rows_eff, c_eff)
    w2 = jnp.tile(weight.astype(jnp.float32), pack).reshape(1, c_eff)
    b2 = jnp.tile(bias.astype(jnp.float32), pack).reshape(1, c_eff)

    # One-hot channel->group matrix (+ transpose); pad the group axis to a
    # multiple of 8 with zero columns (harmless) for friendly matmul shapes.
    g_pad = _round_up(g_eff, 8)
    grp_of_ch = jnp.arange(c_eff) // cg
    gmat = (grp_of_ch[:, None] == jnp.arange(g_pad)[None, :]).astype(jnp.float32)
    gmat_t = gmat.T

    itemsize = x.dtype.itemsize
    if row_tile is None:
        row_tile = _auto_row_tile(rows_eff, c_eff, itemsize, itemsize)
    if rows_eff >= 8:
        row_tile = min(row_tile, _round_up(rows_eff, 8))
        row_tile = max(8, row_tile - row_tile % 8)
    else:
        row_tile = rows_eff  # block == full dim: exempt from 8-divisibility

    grid = (pl.cdiv(rows_eff, row_tile),)  # ragged trailing block handled by Pallas

    kernel = functools.partial(_group_norm_kernel, cg=cg, eps=eps)

    out2 = pl.pallas_call(
        kernel,
        out_shape=jax.ShapeDtypeStruct((rows_eff, c_eff), x.dtype),
        grid_spec=pltpu.PrefetchScalarGridSpec(
            num_scalar_prefetch=0,
            grid=grid,
            in_specs=[
                pl.BlockSpec((row_tile, c_eff), lambda i: (i, 0)),
                pl.BlockSpec((c_eff, g_pad), lambda i: (0, 0)),
                pl.BlockSpec((g_pad, c_eff), lambda i: (0, 0)),
                pl.BlockSpec((1, c_eff), lambda i: (0, 0)),
                pl.BlockSpec((1, c_eff), lambda i: (0, 0)),
            ],
            out_specs=pl.BlockSpec((row_tile, c_eff), lambda i: (i, 0)),
        ),
        compiler_params=pltpu.CompilerParams(
            dimension_semantics=("parallel",),
            vmem_limit_bytes=32 * 1024 * 1024,  # raise v5e's 16 MiB default; fits v7x
        ),
    )(x2, gmat, gmat_t, w2, b2)

    return out2.reshape(*lead, c)


def group_norm_ref(x, weight, bias, num_groups, eps):
    """Plain-JAX reference mirroring the PyTorch forward (domain_wise=False)."""
    *lead, c = x.shape
    cg = c // num_groups
    xr = x.astype(jnp.float32).reshape(*lead, num_groups, cg)
    mean = xr.mean(axis=-1, keepdims=True)
    var = jnp.sum((xr - mean) ** 2, axis=-1, keepdims=True) / (cg - 1)  # unbiased
    xn = (xr - mean) / jnp.sqrt(var + eps)
    xn = xn.reshape(*lead, c)
    return (xn * weight + bias).astype(x.dtype)


if __name__ == "__main__":
    key = jax.random.PRNGKey(0)
    kx, kw, kb = jax.random.split(key, 3)

    num_groups, num_channels = 4, 32
    x = jax.random.normal(kx, (2, 16, 16, num_channels), dtype=jnp.float32)
    weight = 1.0 + 0.1 * jax.random.normal(kw, (num_channels,), dtype=jnp.float32)
    bias = 0.1 * jax.random.normal(kb, (num_channels,), dtype=jnp.float32)

    out = group_norm(x, weight, bias, num_groups=num_groups, eps=1e-8)
    jax.block_until_ready(out)

    ref = group_norm_ref(x, weight, bias, num_groups, 1e-8)
    assert out.shape == ref.shape
    assert jnp.allclose(out, ref, atol=1e-4, rtol=1e-4), float(
        jnp.max(jnp.abs(out - ref)))

    print("KERNEL_OK")
</pallas_src>

<mosaic_0001>
module attributes {stable_mosaic.version = 11 : i64} {
  func.func @_group_norm_kernel(%arg0: i32, %arg1: memref<64x128xf32, #tpu.memory_space<vmem>>, %arg2: memref<128x16xf32, #tpu.memory_space<vmem>>, %arg3: memref<16x128xf32, #tpu.memory_space<vmem>>, %arg4: memref<1x128xf32, #tpu.memory_space<vmem>>, %arg5: memref<1x128xf32, #tpu.memory_space<vmem>>, %arg6: memref<64x128xf32, #tpu.memory_space<vmem>>) attributes {dimension_semantics = [#tpu.dimension_semantics<parallel>], iteration_bounds = array<i64: 2>, scalar_prefetch = 0 : i64, scratch_operands = 0 : i64, tpu.core_type = #tpu.core_type<tc>, window_params = [{transform_indices = @transform_0, window_bounds = array<i64: 64, 128>}, {pipeline_mode = #tpu.pipeline_mode<synchronous>, transform_indices = @transform_1, window_bounds = array<i64: 128, 16>}, {pipeline_mode = #tpu.pipeline_mode<synchronous>, transform_indices = @transform_2, window_bounds = array<i64: 16, 128>}, {pipeline_mode = #tpu.pipeline_mode<synchronous>, transform_indices = @transform_3, window_bounds = array<i64: 1, 128>}, {pipeline_mode = #tpu.pipeline_mode<synchronous>, transform_indices = @transform_4, window_bounds = array<i64: 1, 128>}, {transform_indices = @transform_5, window_bounds = array<i64: 64, 128>}]} {
    %c0 = arith.constant 0 : index
    %c0_0 = arith.constant 0 : index
    %0 = vector.load %arg1[%c0, %c0_0] : memref<64x128xf32, #tpu.memory_space<vmem>>, vector<64x128xf32>
    %c0_1 = arith.constant 0 : index
    %c0_2 = arith.constant 0 : index
    %1 = vector.load %arg2[%c0_1, %c0_2] : memref<128x16xf32, #tpu.memory_space<vmem>>, vector<128x16xf32>
    %c0_3 = arith.constant 0 : index
    %c0_4 = arith.constant 0 : index
    %2 = vector.load %arg3[%c0_3, %c0_4] : memref<16x128xf32, #tpu.memory_space<vmem>>, vector<16x128xf32>
    %cst = arith.constant dense<0.000000e+00> : vector<64x16xf32>
    %3 = tpu.matmul %0, %1, %cst {dimension_numbers = #tpu.dot_dimension_numbers<[1], [0], [0], [1], [0, 0, 1, 1], [], []>, precision = #tpu.contract_precision<fp32>} : vector<64x128xf32>, vector<128x16xf32>, vector<64x16xf32> -> vector<64x16xf32>
    %cst_5 = arith.constant 1.250000e-01 : f32
    %4 = vector.broadcast %cst_5 : f32 to vector<64x16xf32>
    %5 = arith.mulf %3, %4 : vector<64x16xf32>
    %cst_6 = arith.constant dense<0.000000e+00> : vector<64x128xf32>
    %6 = tpu.matmul %5, %2, %cst_6 {dimension_numbers = #tpu.dot_dimension_numbers<[1], [0], [0], [1], [0, 0, 1, 1], [], []>, precision = #tpu.contract_precision<fp32>} : vector<64x16xf32>, vector<16x128xf32>, vector<64x128xf32> -> vector<64x128xf32>
    %7 = arith.subf %0, %6 : vector<64x128xf32>
    %8 = arith.mulf %7, %7 : vector<64x128xf32>
    %cst_7 = arith.constant dense<0.000000e+00> : vector<64x16xf32>
    %9 = tpu.matmul %8, %1, %cst_7 {dimension_numbers = #tpu.dot_dimension_numbers<[1], [0], [0], [1], [0, 0, 1, 1], [], []>, precision = #tpu.contract_precision<fp32>} : vector<64x128xf32>, vector<128x16xf32>, vector<64x16xf32> -> vector<64x16xf32>
    %cst_8 = arith.constant 0.142857149 : f32
    %10 = vector.broadcast %cst_8 : f32 to vector<64x16xf32>
    %11 = arith.mulf %9, %10 : vector<64x16xf32>
    %cst_9 = arith.constant dense<0.000000e+00> : vector<64x128xf32>
    %12 = tpu.matmul %11, %2, %cst_9 {dimension_numbers = #tpu.dot_dimension_numbers<[1], [0], [0], [1], [0, 0, 1, 1], [], []>, precision = #tpu.contract_precision<fp32>} : vector<64x16xf32>, vector<16x128xf32>, vector<64x128xf32> -> vector<64x128xf32>
    %cst_10 = arith.constant 9.99999993E-9 : f32
    %13 = vector.broadcast %cst_10 : f32 to vector<64x128xf32>
    %14 = arith.addf %12, %13 : vector<64x128xf32>
    %15 = math.rsqrt %14 : vector<64x128xf32>
    %16 = arith.mulf %7, %15 : vector<64x128xf32>
    %c0_11 = arith.constant 0 : index
    %c0_12 = arith.constant 0 : index
    %17 = vector.load %arg4[%c0_11, %c0_12] : memref<1x128xf32, #tpu.memory_space<vmem>>, vector<1x128xf32>
    %18 = vector.broadcast %17 : vector<1x128xf32> to vector<64x128xf32>
    %19 = arith.mulf %16, %18 : vector<64x128xf32>
    %c0_13 = arith.constant 0 : index
    %c0_14 = arith.constant 0 : index
    %20 = vector.load %arg5[%c0_13, %c0_14] : memref<1x128xf32, #tpu.memory_space<vmem>>, vector<1x128xf32>
    %21 = vector.broadcast %20 : vector<1x128xf32> to vector<64x128xf32>
    %22 = arith.addf %19, %21 : vector<64x128xf32>
    %c0_15 = arith.constant 0 : index
    %c0_16 = arith.constant 0 : index
    %23 = vector.load %arg6[%c0_15, %c0_16] : memref<64x128xf32, #tpu.memory_space<vmem>>, vector<64x128xf32>
    tpu.vector_store %arg6[%c0_15, %c0_16], %22 {strides = array<i32>} : memref<64x128xf32, #tpu.memory_space<vmem>>, vector<64x128xf32>,
    return
  }
  func.func @transform_0(%arg0: i32) -> (i32, i32) {
    %c0_i32 = arith.constant 0 : i32
    %c0_i32_0 = arith.constant 0 : i32
    return %arg0, %c0_i32 : i32, i32
  }
  func.func @transform_1(%arg0: i32) -> (i32, i32) {
    %c0_i32 = arith.constant 0 : i32
    %c0_i32_0 = arith.constant 0 : i32
    %c0_i32_1 = arith.constant 0 : i32
    return %c0_i32, %c0_i32_0 : i32, i32
  }
  func.func @transform_2(%arg0: i32) -> (i32, i32) {
    %c0_i32 = arith.constant 0 : i32
    %c0_i32_0 = arith.constant 0 : i32
    %c0_i32_1 = arith.constant 0 : i32
    return %c0_i32, %c0_i32_0 : i32, i32
  }
  func.func @transform_3(%arg0: i32) -> (i32, i32) {
    %c0_i32 = arith.constant 0 : i32
    %c0_i32_0 = arith.constant 0 : i32
    %c0_i32_1 = arith.constant 0 : i32
    return %c0_i32, %c0_i32_0 : i32, i32
  }
  func.func @transform_4(%arg0: i32) -> (i32, i32) {
    %c0_i32 = arith.constant 0 : i32
    %c0_i32_0 = arith.constant 0 : i32
    %c0_i32_1 = arith.constant 0 : i32
    return %c0_i32, %c0_i32_0 : i32, i32
  }
  func.func @transform_5(%arg0: i32) -> (i32, i32) {
    %c0_i32 = arith.constant 0 : i32
    %c0_i32_0 = arith.constant 0 : i32
    return %arg0, %c0_i32 : i32, i32
  }
}

</mosaic_0001>

<bundles_post_ra>
// kernel: tpu_custom_call.1
= control target key start
LH: loop header
LB: loop body
LE: loop exit
PB: predicated region body
PF: predicated region fallthrough
CT: control target
= control target key end

     0   :  { %10 = vsyncpa [#allocation3], 0  ;;  %s6918_s0 = inlined_call_operand.vmem [shape: f32[128,128], index: 0, kind: input, shape index: {}]   ;;  %s6919_s1 = inlined_call_operand.vmem [shape: f32[128,16], index: 1, kind: input, shape index: {}]   ;;  %s6920_s2 = inlined_call_operand.vmem [shape: f32[16,128], index: 2, kind: input, shape index: {}]   ;;  %s6921_s3 = inlined_call_operand.vmem [shape: f32[1,128], index: 3, kind: input, shape index: {}]   ;;  %s6922_s4 = inlined_call_operand.vmem [shape: f32[1,128], index: 4, kind: input, shape index: {}]   ;;  %s6923_s5 = inlined_call_operand.hbm [shape: f32[128,128], index: 5, kind: output, shape index: {}]  }
   0x1   :  { %12 = vsyncpa [#allocation3 + $0x1], 0  ;;  %s5766_s18 = smov 0   ;;  %s5768_s19 = smov 0  }
   0x2   :  { %s5770_s20 = smov 0   ;;  %s5772_s21 = smov 0  }
   0x3 LB: > { %s5787_s22 = sadd.s32 4294967295, %s5731_s21   ;;  %s3867_s23 = sadd.s32 4294967294, %s5731_s21   ;;  %s5731_s21 = sphi %s5772_s21, %s7056_s21   ;;  %s5727_s20 = sphi %s5770_s20, %s7055_s20   ;;  %s5723_s19 = sphi %s5768_s19, %s7054_s19   ;;  %s5719_s18 = sphi %s5766_s18, %s7053_s18  }
   0x4   : > { %s5791_s24 = sadd.s32 1, %s5731_s21   ;;  %s135_s25 = sadd.s32 1, %s5727_s20 }
   0x5   : > { %s132_s26 = ssub.s32 %s5731_s21, %s5791_s24  ;;  %p145_p0 = scmp.ne.s32.totalorder %s5727_s20, %s5723_s19 }
   0x6   : > { %p133_p1 = scmp.eq.s32.totalorder %s132_s26, 0  ;;  %p146_p2 = scmp.eq.s32.totalorder %s5787_s22, 1 }
   0x7   : > { %p151_p3 = scmp.ne.s32.totalorder %s5723_s19, %s5719_s18  ;;  %p152_p4 = scmp.eq.s32.totalorder %s3867_s23, 1 }
   0x8   : > { %s5802_s27 = scalar_select %p133_p1, %s5727_s20, %s135_s25  }
   0x9   : > { %p5804_p5 = por %p146_p2, %p145_p0  ;;  %p5808_p6 = por %p152_p4, %p151_p3 }
   0xa   : > { %p3870_p7 = scmp.ge.s32.totalorder %s5731_s21, 1  ;;  %p191_p8 = scmp.lt.s32.totalorder %s5731_s21, 3 }
   0xc   : > { %p192_p9 = pnand %p3870_p7, %p191_p8 }
   0xe   : > { %195 = sbr.rel (%p192_p9) target bundleno = 1475 (0x5c3), region = 40 }
  0x15   : > { %v234_v0 = vld [vmem:[%s6919_s1] sm:$0xff]  ;;  %v235_v1 = vld [vmem:[%s6919_s1 + $0x8] sm:$0xff]  ;;  %v236_v2 = vld [vmem:[%s6919_s1 + $0x10] sm:$0xff]  ;;  %s3872_s11 = sshll.u32 %s5787_s22, 3  ;;  %vm1202_vm0 = vcmask 130048   ;;  %s3881_s30 = sshll.u32 %s5787_s22, 10 }
  0x16   : > { %v253_v3 = vand.u32 4294901760, %v234_v0  ;;  %v256_v4 = vand.u32 4294901760, %v235_v1  ;;  %v237_v5 = vld [vmem:[%s6919_s1 + $0x18] sm:$0xff]  ;;  %v259_v6 = vand.u32 4294901760, %v236_v2  ;;  %v238_v7 = vld [vmem:[%s6919_s1 + $0x20] sm:$0xff]  ;;  %v239_v8 = vld [vmem:[%s6919_s1 + $0x28] sm:$0xff]  ;;  %s6869_s9 = scalar_lea.hbm %s6923_s5, %s3881_s30 }
  0x17   : > { %v262_v9 = vand.u32 4294901760, %v237_v5  ;;  %v265_v11 = vand.u32 4294901760, %v238_v7  ;;  %v268_v12 = vand.u32 4294901760, %v239_v8  ;;  %v240_v14 = vld [vmem:[%s6919_s1 + $0x30] sm:$0xff]  ;;  %v5843_v15 = vld [vmem:[%s6919_s1 + $0x38] sm:$0xff]  ;;  %p220_p10 = scmp.lt.s32.totalorder %s3872_s11, 15 }
  0x18   : > { %v5833_v10 = vpack.c.bf16 %v256_v4, %v253_v3  ;;  %v271_v17 = vand.u32 4294901760, %v240_v14  ;;  %v274_v18 = vand.u32 4294901760, %v5843_v15  ;;  %v5854_v19 = vld [vmem:[%s6919_s1 + $0x40] sm:$0xff]  ;;  %v5859_v20 = vld [vmem:[%s6919_s1 + $0x48] sm:$0xff]  ;;  %v5872_v24 = vsub.f32 %v234_v0, %v253_v3  ;;  %v5882_v27 = vld [vmem:[%s6919_s1 + $0x50] sm:$0xff]  ;;  %s5733_s12 = smov [#allocation2]  }
  0x19   : > { %v5835_v13 = vpack.c.bf16 %v262_v9, %v259_v6  ;;  %s7058_s11 = smov (!%p220_p10, %s3872_s11), 15  ;;  %v5848_v16 = vpack.c.bf16 %v268_v12, %v265_v11  ;;  %v277_v21 = vand.u32 4294901760, %v5854_v19  ;;  %v280_v22 = vand.u32 4294901760, %v5859_v20  ;;  %v5887_v28 = vld [vmem:[%s6919_s1 + $0x58] sm:$0xff]  ;;  %v5899_v32 = vld [vmem:[%s6919_s1 + $0x60] sm:$0xff]  ;;  %v5927_v42 = vld [vmem:[%s6919_s1 + $0x68] sm:$0xff] }
  0x1a   : > { %5011 = vmatprep.subr.bf16.mxu0 %v5833_v10  ;;  %s3873_s10 = sshll.u32 %s7058_s11, 3  ;;  %v5874_v25 = vsub.f32 %v235_v1, %v256_v4  ;;  %v5877_v26 = vpack.c.bf16 %v274_v18, %v271_v17  ;;  %v5892_v30 = vsub.f32 %v236_v2, %v259_v6  ;;  %v5894_v31 = vsub.f32 %v237_v5, %v262_v9  ;;  %v5942_v49 = vld [vmem:[%s6919_s1 + $0x70] sm:$0xff]  ;;  %v5947_v50 = vld [vmem:[%s6919_s1 + $0x78] sm:$0xff]  ;;  %s216_s11 = sand.u32 1, %s5723_s19  }
  0x1b   : > { %5013 = vmatpush3.bf16.msra.mxu0 %v5833_v10  ;;  %6980 = vst [vmem:[#allocation5_spill] sm:$0xff] %v5848_v16  ;;  %s5864_s14 = scalar_lea.vmem %s6918_s0, %s3873_s10  ;;  %v5908_v35 = vsub.f32 %v238_v7, %v265_v11  ;;  %v5910_v36 = vsub.f32 %v239_v8, %v268_v12  ;;  %v283_v37 = vand.u32 4294901760, %v5882_v27  ;;  %v286_v38 = vand.u32 4294901760, %v5887_v28  ;;  %s3871_s17 = sshll.u32 %s216_s11, 6 }
  0x1c   : > { %5015 = vmatprep.subr.bf16.mxu0 %v5835_v13  ;;  %v5870_v23 = vld [vmem:[%s5864_s14] sm:$0xff]  ;;  %6982 = vst [vmem:[#allocation7_spill] sm:$0xff] %v5877_v26  ;;  %v5906_v34 = vld [vmem:[%s5864_s14 + $0x8] sm:$0xff]  ;;  %v6931_v39 = vand.u32 4294901760, %v5872_v24  ;;  %v6930_v40 = vand.u32 4294901760, %v5874_v25  ;;  %v5922_v41 = vpack.c.bf16 %v280_v22, %v277_v21  ;;  %v6928_v44 = vand.u32 4294901760, %v5892_v30 }
  0x1d   : > { %6981 = vst [vmem:[#allocation6_spill] sm:$0xff] %v5870_v23  ;;  %v5890_v29 = vand.u32 4294901760, %v5870_v23  ;;  %6983 = vst [vmem:[#allocation8_spill] sm:$0xff] %v5906_v34  ;;  %v6927_v45 = vand.u32 4294901760, %v5894_v31  ;;  %v5933_v46 = vld [vmem:[%s5864_s14 + $0x10] sm:$0xff]  ;;  %v6934_v47 = vand.u32 4294901760, %v5899_v32  ;;  %v5954_v54 = vsub.f32 %v240_v14, %v271_v17 }
  0x1e   : > { %6984 = vst [vmem:[#allocation9_spill] sm:$0xff] %v5922_v41  ;;  %6985 = vst [vmem:[#allocation10_spill] sm:$0xff] %v5933_v46  ;;  %v5937_v48 = vand.u32 4294901760, %v5906_v34  ;;  %v6926_v52 = vand.u32 4294901760, %v5908_v35  ;;  %v6925_v53 = vand.u32 4294901760, %v5910_v36  ;;  %v6932_v55 = vand.u32 4294901760, %v5927_v42 }
  0x1f   : > { %5017 = vmatpush3.bf16.msra.mxu0 %v5835_v13  ;;  %v5903_v33 = vsub.f32 %v5870_v23, %v5890_v29  ;;  %v417_v56 = vsub.f32 %v5872_v24, %v6931_v39  ;;  %v424_v57 = vsub.f32 %v5874_v25, %v6930_v40  ;;  %v5965_v58 = vand.u32 4294901760, %v5933_v46  ;;  %v5968_v59 = vld [vmem:[%s5864_s14 + $0x18] sm:$0xff]  ;;  %v5984_v0 = vld [vmem:[%s5864_s14 + $0x20] sm:$0xff]  ;;  %s6852_s26 = scalar_lea.vmem [#allocation2], %s3871_s17  ;;  %s6877_s22 = scalar_lea.sflag [#allocation3], %s216_s11 }
  0x20   : > { %5019 = vmatprep.subr.bf16.mxu0 %v5848_v16  ;;  %6986 = vst [vmem:[#allocation11_spill] sm:$0xff] %v5968_v59  ;;  %v5975_v60 = vpack.c.bf16 %v286_v38, %v283_v37  ;;  %v431_v62 = vsub.f32 %v5892_v30, %v6928_v44  ;;  %v438_v63 = vsub.f32 %v5894_v31, %v6927_v45  ;;  %6988 = vst [vmem:[#allocation13_spill] sm:$0xff] %v5984_v0  ;;  %s3805_s6 = sshll.u32 %s6852_s26, 4  ;;  %s5673_s13 = sshll.u32 %s5733_s12, 4  ;;  %s6871_s6 = int_to_ptr.vmem [resolvable:$true] %s3805_s6  ;;  %s5674_s13 = int_to_ptr.vmem [resolvable:$false] %s5673_s13 }
  0x21   : > { %v6924_v43 = vand.u32 4294901760, %v5903_v33  ;;  %v295_v1 = vand.u32 4294901760, %v5942_v49  ;;  %v298_v2 = vand.u32 4294901760, %v5947_v50  ;;  %v5990_v3 = vsub.f32 %v5906_v34, %v5937_v48  ;;  %s5669_s10 = scalar_lea.vmem %s6871_s6, 1024  ;;  %p5676_p0 = scmp.lt.s32.totalorder %s6871_s6, %s5674_s13 }
  0x22   : > { %6987 = vst [vmem:[#allocation12_spill] sm:$0xff] %v5975_v60  ;;  %v5993_v4 = vsub.f32 %v5843_v15, %v274_v18  ;;  %v445_v5 = vsub.f32 %v5908_v35, %v6926_v52  ;;  %v452_v6 = vsub.f32 %v5910_v36, %v6925_v53  ;;  %v6929_v7 = vand.u32 4294901760, %v5954_v54  ;;  %p5670_p11 = scmp.ne.s32.totalorder %s6871_s6, %s5669_s10 }
  0x23   : > { %5021 = vmatpush3.bf16.msra.mxu0 %v5848_v16  ;;  %v336_v51 = vsub.f32 %v5903_v33, %v6924_v43  ;;  %v6003_v8 = vand.u32 4294901760, %v5968_v59  ;;  %v418_v9 = vand.u32 4294901760, %v417_v56  ;;  %v425_v11 = vand.u32 4294901760, %v424_v57 }
  0x24   : > { %5023 = vmatprep.subr.bf16.mxu0 %v5877_v26  ;;  %v6008_v12 = vsub.f32 %v5933_v46, %v5965_v58  ;;  %v6011_v14 = vand.u32 4294901760, %v5984_v0  ;;  %v6018_v15 = vpack.c.bf16 %v6932_v55, %v6934_v47  ;;  %v432_v17 = vand.u32 4294901760, %v431_v62  ;;  %v6035_v62 = vld [vmem:[%s5864_s14 + $0x30] sm:$0xff]  ;;  %p5671_p12 = pnand %p5670_p11, %p5804_p5 }
  0x25   : > { %v337_v61 = vand.u32 4294901760, %v336_v51  ;;  %v439_v18 = vand.u32 4294901760, %v438_v63  ;;  %v6022_v51 = vsub.f32 %v5968_v59, %v6003_v8  ;;  %v6933_v56 = vand.u32 4294901760, %v5990_v3  ;;  %6991 = vst [vmem:[#allocation16_spill] sm:$0xff] %v6035_v62 }
  0x26   : > { %6989 = vst [vmem:[#allocation14_spill] sm:$0xff] %v6018_v15  ;;  %v465_v57 = vand.u32 4294901760, %v5993_v4  ;;  %v446_v43 = vand.u32 4294901760, %v445_v5  ;;  %v453_v53 = vand.u32 4294901760, %v452_v6  ;;  %v6032_v52 = vsub.f32 %v5954_v54, %v6929_v7  ;;  %p5672_p13 = pneg %p5671_p12 }
  0x27   : > { %5025 = vmatpush3.bf16.msra.mxu0 %v5877_v26  ;;  %4322 = vmatprep.mubr.f32.mxu0 %v337_v61  ;;  %v6027_v61 = vld [vmem:[%s5864_s14 + $0x28] sm:$0xff]  ;;  %v6038_v63 = vpack.c.bf16 %v298_v2, %v295_v1  ;;  %v6040_v45 = vpack.c.bf16 %v425_v11, %v418_v9  ;;  %v6935_v44 = vand.u32 4294901760, %v6008_v12  ;;  %v6045_v5 = vsub.f32 %v5984_v0, %v6011_v14 }
  0x28   : > { %5027 = vmatprep.subr.bf16.mxu0 %v5922_v41  ;;  %6990 = vst [vmem:[#allocation15_spill] sm:$0xff] %v6027_v61  ;;  %v6048_v6 = vpack.c.bf16 %v439_v18, %v432_v17  ;;  %v6053_v7 = vsub.f32 %v5854_v19, %v277_v21  ;;  %v6938_v40 = vand.u32 4294901760, %v6022_v51  ;;  %v6057_v9 = vand.u32 4294901760, %v6027_v61  ;;  %v6074_v21 = vld [vmem:[%s5864_s14 + $0x38] sm:$0xff]  ;;  %s5675_s14 = scalar_lea.vmem %s5674_s13, 2048 }
  0x29   : > { %6992 = vst [vmem:[#allocation17_spill] sm:$0xff] %v6038_v63  ;;  %6993 = vst [vmem:[#allocation18_spill] sm:$0xff] %v6040_v45  ;;  %v346_v11 = vsub.f32 %v5990_v3, %v6933_v56  ;;  %v6063_v39 = vsub.f32 %v5993_v4, %v465_v57  ;;  %v6068_v17 = vsub.f32 %v5859_v20, %v280_v22  ;;  %v6071_v19 = vand.u32 4294901760, %v6035_v62  ;;  %p5677_p1 = scmp.lt.s32.totalorder %s5675_s14, %s5669_s10 }
  0x2a   : > { %6994 = vst [vmem:[#allocation19_spill] sm:$0xff] %v6074_v21  ;;  %v6076_v18 = vpack.c.bf16 %v453_v53, %v446_v43  ;;  %v460_v55 = vand.u32 4294901760, %v6032_v52  ;;  %v6082_v56 = vsub.f32 %v5882_v27, %v283_v37  ;;  %v6086_v47 = vsub.f32 %v6027_v61, %v6057_v9 }
  0x2b   : > { %5029 = vmatpush3.bf16.msra.mxu0 %v5922_v41  ;;  %v356_v20 = vsub.f32 %v6008_v12, %v6935_v44  ;;  %v6095_v22 = vsub.f32 %v5887_v28, %v286_v38  ;;  %v6100_v27 = vsub.f32 %v6035_v62, %v6071_v19  ;;  %v366_v37 = vsub.f32 %v6022_v51, %v6938_v40  ;;  %p5678_p2 = por %p5677_p1, %p5676_p0 }
  0x2c   : > { %5031 = vmatprep.subr.bf16.mxu0 %v5975_v60  ;;  %6995 = vst [vmem:[#allocation20_spill] sm:$0xff] %v6086_v47  ;;  %v6996_v52 = vand.u32 4294901760, %v5899_v32  ;;  %v6997_v28 = vand.u32 4294901760, %v5927_v42  ;;  %v6117_v44 = vand.u32 4294901760, %v6074_v21  ;;  %v472_v43 = vand.u32 4294901760, %v6053_v7 }
  0x2d   : > { %v6122_v0 = vsub.f32 %v5942_v49, %v295_v1  ;;  %v6125_v40 = vsub.f32 %v5947_v50, %v298_v2  ;;  %v479_v61 = vand.u32 4294901760, %v6068_v17  ;;  %v486_v62 = vand.u32 4294901760, %v6082_v56  ;;  %p5679_p3 = pnand %p5678_p2, %p5672_p13 }
  0x2e   : > { %v6109_v53 = vsub.f32 %v5899_v32, %v6996_v52  ;;  %v6114_v38 = vsub.f32 %v5927_v42, %v6997_v28  ;;  %v347_v32 = vand.u32 4294901760, %v346_v11  ;;  %v467_v52 = vand.u32 4294901760, %v6063_v39 }
  0x2f   : > { %5033 = vmatpush3.bf16.msra.mxu0 %v5975_v60  ;;  %v6131_v42 = vsub.f32 %v6074_v21, %v6117_v44  ;;  %v357_v28 = vand.u32 4294901760, %v356_v20  ;;  %v6998_v49 = vand.u32 4294901760, %v6045_v5  ;;  %v493_v39 = vand.u32 4294901760, %v6095_v22 }
  0x30   : > { %5035 = vmatprep.subr.bf16.mxu0 %v6018_v15  ;;  %v367_v2 = vand.u32 4294901760, %v366_v37  ;;  %v500_v11 = vand.u32 4294901760, %v6109_v53  ;;  %v507_v21 = vand.u32 4294901760, %v6114_v38  ;;  %v6999_v46 = vand.u32 4294901760, %v6086_v47 }
  0x31   : > { %v376_v1 = vsub.f32 %v6045_v5, %v6998_v49  ;;  %v514_v59 = vand.u32 4294901760, %v6122_v0  ;;  %v521_v23 = vand.u32 4294901760, %v6125_v40  ;;  %v7000_v49 = vand.u32 4294901760, %v5872_v24 }
  0x32   : > { %v386_v20 = vsub.f32 %v6086_v47, %v6999_v46  ;;  %v7001_v50 = vand.u32 4294901760, %v5874_v25  ;;  %v6963_v37 = vand.u32 4294901760, %v6131_v42  ;;  %v7004_v46 = vand.u32 4294901760, %v5908_v35 }
  0x33   : > { %5037 = vmatpush3.bf16.msra.mxu0 %v6018_v15  ;;  %v7003_v15 = vand.u32 4294901760, %v5894_v31  ;;  %v7005_v41 = vand.u32 4294901760, %v5910_v36  ;;  %v7006_v47 = vand.u32 4294901760, %v5954_v54 }
  0x34   : > { %5039 = vmatprep.subr.bf16.mxu0 %v6038_v63  ;;  %v6152_v34 = vpack.c.bf16 %v7001_v50, %v7000_v49  ;;  %v7007_v50 = vand.u32 4294901760, %v6100_v27 }
  0x35   : > { %v6165_v26 = vpack.c.bf16 %v7005_v41, %v7004_v46  ;;  %v6169_v16 = vpack.c.bf16 %v465_v57, %v7006_v47  ;;  %v473_v41 = vsub.f32 %v6053_v7, %v472_v43  ;;  %v480_v46 = vsub.f32 %v6068_v17, %v479_v61 }
  0x36   : > { %v396_v49 = vsub.f32 %v6100_v27, %v7007_v50  ;;  %v6182_v47 = vpack.c.bf16 %v507_v21, %v500_v11  ;;  %v6184_v57 = vpack.c.bf16 %v521_v23, %v514_v59  ;;  %v487_v50 = vsub.f32 %v6082_v56, %v486_v62 }
  0x37   : > { %5041 = vmatpush3.bf16.msra.mxu0 %v6038_v63  ;;  %v7002_v63 = vand.u32 4294901760, %v5892_v30 }
  0x38   : > { %5043 = vmatprep.subr.bf16.mxu0 %v6040_v45  ;;  %7009 = vst [vmem:[#allocation22_spill] sm:$0xff] %v6182_v47  ;;  %7010 = vst [vmem:[#allocation23_spill] sm:$0xff] %v6184_v57  ;;  %v474_v47 = vand.u32 4294901760, %v473_v41  ;;  %v481_v57 = vand.u32 4294901760, %v480_v46  ;;  %v522_v41 = vsub.f32 %v6125_v40, %v521_v23  ;;  %v6220_v23 = vpack.c.bf16 %v5874_v25, %v5872_v24 }
  0x39   : > { %v6159_v60 = vpack.c.bf16 %v7003_v15, %v7002_v63  ;;  %v6175_v15 = vpack.c.bf16 %v479_v61, %v472_v43  ;;  %v6177_v63 = vpack.c.bf16 %v493_v39, %v486_v62  ;;  %v397_v43 = vand.u32 4294901760, %v396_v49 }
  0x3a   : > { %4323 = vmatmul.mubr.f32.vlgmr.msra.gmra.mrb[0].mxu0 %v347_v32  ;;  %v377_v32 = vand.u32 4294901760, %v376_v1  ;;  %v406_v1 = vsub.f32 %v6131_v42, %v6963_v37  ;;  %v6193_v61 = vpack.c.bf16 %v467_v52, %v460_v55  ;;  %v6197_v62 = vpack.c.bf16 %v481_v57, %v474_v47 }
  0x3b   : > { %5045 = vmatpush3.bf16.msra.mxu0 %v6040_v45  ;;  %4325 = vmatprep.mubr.f32.mxu0 %v357_v28  ;;  %7008 = vst [vmem:[#allocation21_spill] sm:$0xff] %v6177_v63  ;;  %v387_v28 = vand.u32 4294901760, %v386_v20  ;;  %v494_v45 = vsub.f32 %v6095_v22, %v493_v39  ;;  %v488_v20 = vand.u32 4294901760, %v487_v50  ;;  %v501_v39 = vsub.f32 %v6109_v53, %v500_v11 }
  0x3c   : > { %5047 = vmatprep.subr.bf16.mxu0 %v6048_v6  ;;  %v515_v49 = vsub.f32 %v6122_v0, %v514_v59  ;;  %v523_v46 = vand.u32 4294901760, %v522_v41  ;;  %v6226_v59 = vpack.c.bf16 %v5894_v31, %v5892_v30  ;;  %v6234_v24 = vpack.c.bf16 %v5910_v36, %v5908_v35 }
  0x3d   : > { %v495_v37 = vand.u32 4294901760, %v494_v45  ;;  %v502_v52 = vand.u32 4294901760, %v501_v39  ;;  %v6242_v25 = vpack.c.bf16 %v5993_v4, %v5954_v54  ;;  %v6250_v30 = vpack.c.bf16 %v6068_v17, %v6053_v7  ;;  %v7012_v54 = vld [vmem:[#allocation20_spill] sm:$0xff]  ;;  %v7015_v7 = vld [vmem:[#allocation9_spill] sm:$0xff]  ;;  %v7017_v17 = vld [vmem:[#allocation14_spill] sm:$0xff] }
  0x3e   : > { %4326 = vmatmul.mubr.f32.gmra.mrb[2].mxu0 %v367_v2  ;;  %v407_v2 = vand.u32 4294901760, %v406_v1  ;;  %v516_v11 = vand.u32 4294901760, %v515_v49  ;;  %v6258_v31 = vpack.c.bf16 %v6095_v22, %v6082_v56  ;;  %v6264_v35 = vpack.c.bf16 %v6114_v38, %v6109_v53  ;;  %v7016_v56 = vld [vmem:[#allocation12_spill] sm:$0xff]  ;;  %v7018_v22 = vld [vmem:[#allocation17_spill] sm:$0xff] }
  0x3f   : > { %5049 = vmatpush3.bf16.msra.mxu0 %v6048_v6  ;;  %4328 = vmatprep.mubr.f32.mxu0 %v377_v32  ;;  %v508_v32 = vsub.f32 %v6114_v38, %v507_v21  ;;  %v6202_v55 = vpack.c.bf16 %v495_v37, %v488_v20  ;;  %v6270_v36 = vpack.c.bf16 %v6125_v40, %v6122_v0  ;;  %v7011_v40 = vld [vmem:[#allocation5_spill] sm:$0xff]  ;;  %v7013_v0 = vld [vmem:[#allocation7_spill] sm:$0xff]  ;;  %v7014_v4 = vand.u32 4294901760, %v5903_v33 }
  0x40   : > { %5051 = vmatprep.subr.bf16.mxu0 %v6076_v18  ;;  %v6214_v37 = vpack.c.bf16 %v523_v46, %v516_v11  ;;  %v7020_v53 = vand.u32 4294901760, %v6008_v12  ;;  %v7021_v38 = vand.u32 4294901760, %v6022_v51  ;;  %v7022_v47 = vand.u32 4294901760, %v6045_v5 }
  0x41   : > { %v509_v45 = vand.u32 4294901760, %v508_v32 }
  0x42   : > { %4329 = vmatmul.mubr.f32.gmra.mrb[4].mxu0 %v387_v28 }
  0x43   : > { %5053 = vmatpush3.bf16.msra.mxu0 %v6076_v18  ;;  %4331 = vmatprep.mubr.f32.mxu0 %v397_v43  ;;  %v6210_v21 = vpack.c.bf16 %v509_v45, %v502_v52 }
  0x44   : > { %5055 = vmatprep.subr.bf16.mxu0 %v6193_v61 }
  0x46   : > { %4332 = vmatmul.mubr.f32.gmra.mrb[6].mxu0 %v407_v2 }
  0x47   : > { %5057 = vmatpush3.bf16.msra.mxu0 %v6193_v61  ;;  %4366 = vmatprep.mubr.f32.mxu0 %v5890_v29 }
  0x48   : > { %5059 = vmatprep.subr.bf16.mxu0 %v6197_v62 }
  0x4b   : > { %5061 = vmatpush3.bf16.msra.mxu0 %v6197_v62 }
  0x4c   : > { %5063 = vmatprep.subr.bf16.mxu0 %v6202_v55 }
  0x4f   : > { %5065 = vmatpush3.bf16.msra.mxu0 %v6202_v55 }
  0x50   : > { %5067 = vmatprep.subr.bf16.mxu0 %v6210_v21 }
  0x53   : > { %5069 = vmatpush3.bf16.msra.mxu0 %v6210_v21 }
  0x54   : > { %5071 = vmatprep.subr.bf16.mxu0 %v6214_v37 }
  0x57   : > { %5073 = vmatpush3.bf16.msra.mxu0 %v6214_v37 }
  0x58   : > { %5075 = vmatprep.subr.bf16.mxu0 %v6220_v23 }
  0x5a   : > { %4367 = vmatmul.mubr.f32.vlgmr.msra.gmra.mrb[0].mxu0 %v5937_v48 }
  0x5b   : > { %5077 = vmatpush3.bf16.msra.mxu0 %v6220_v23  ;;  %4369 = vmatprep.mubr.f32.mxu0 %v5965_v58 }
  0x5c   : > { %5079 = vmatprep.subr.bf16.mxu0 %v6226_v59 }
  0x5e   : > { %4370 = vmatmul.mubr.f32.gmra.mrb[2].mxu0 %v6003_v8 }
  0x5f   : > { %5081 = vmatpush3.bf16.msra.mxu0 %v6226_v59  ;;  %4372 = vmatprep.mubr.f32.mxu0 %v6011_v14 }
  0x60   : > { %5083 = vmatprep.subr.bf16.mxu0 %v6234_v24 }
  0x62   : > { %4373 = vmatmul.mubr.f32.gmra.mrb[4].mxu0 %v6057_v9 }
  0x63   : > { %5085 = vmatpush3.bf16.msra.mxu0 %v6234_v24  ;;  %4375 = vmatprep.mubr.f32.mxu0 %v6071_v19 }
  0x64   : > { %5087 = vmatprep.subr.bf16.mxu0 %v6242_v25 }
  0x66   : > { %4376 = vmatmul.mubr.f32.gmra.mrb[6].mxu0 %v6117_v44 }
  0x67   : > { %5089 = vmatpush3.bf16.msra.mxu0 %v6242_v25  ;;  %4410 = vmatprep.mubr.f32.mxu0 %v5903_v33  ;;  %v7019_v33 = vand.u32 4294901760, %v5990_v3 }
  0x68   : > { %5091 = vmatprep.subr.bf16.mxu0 %v6250_v30 }
  0x6b   : > { %5093 = vmatpush3.bf16.msra.mxu0 %v6250_v30 }
  0x6c   : > { %5095 = vmatprep.subr.bf16.mxu0 %v6258_v31 }
  0x6f   : > { %5097 = vmatpush3.bf16.msra.mxu0 %v6258_v31 }
  0x70   : > { %5099 = vmatprep.subr.bf16.mxu0 %v6264_v35 }
  0x73   : > { %5101 = vmatpush3.bf16.msra.mxu0 %v6264_v35 }
  0x74   : > { %5103 = vmatprep.subr.bf16.mxu0 %v6270_v36 }
  0x77   : > { %5105 = vmatpush3.bf16.msra.mxu0 %v6270_v36 }
  0x78   : > { %5107 = vmatprep.subr.bf16.mxu0 %v5833_v10 }
  0x7a   : > { %4411 = vmatmul.mubr.f32.vlgmr.msra.gmra.mrb[0].mxu0 %v5990_v3  ;;  %v7023_v3 = vand.u32 4294901760, %v7012_v54 }
  0x7b   : > { %5109 = vmatpush3.bf16.msra.mxu0 %v5833_v10  ;;  %4413 = vmatprep.mubr.f32.mxu0 %v6008_v12  ;;  %v7024_v12 = vand.u32 4294901760, %v6100_v27 }
  0x7c   : > { %5111 = vmatprep.subr.bf16.mxu0 %v5835_v13 }
  0x7e   : > { %4414 = vmatmul.mubr.f32.gmra.mrb[2].mxu0 %v6022_v51  ;;  %v7025_v51 = vand.u32 4294901760, %v6131_v42 }
  0x7f   : > { %5113 = vmatpush3.bf16.msra.mxu0 %v5835_v13  ;;  %4416 = vmatprep.mubr.f32.mxu0 %v6045_v5  ;;  %v7026_v5 = vld [vmem:[#allocation22_spill] sm:$0xff] }
  0x80   : > { %5115 = vmatprep.subr.bf16.mxu0 %v7011_v40 }
  0x82   : > { %4417 = vmatmul.mubr.f32.gmra.mrb[4].mxu0 %v7012_v54 }
  0x83   : > { %5117 = vmatpush3.bf16.msra.mxu0 %v7011_v40  ;;  %4419 = vmatprep.mubr.f32.mxu0 %v6100_v27  ;;  %v7027_v27 = vld [vmem:[#allocation23_spill] sm:$0xff] }
  0x84   : > { %5119 = vmatprep.subr.bf16.mxu0 %v7013_v0 }
  0x86   : > { %4420 = vmatmul.mubr.f32.gmra.mrb[6].mxu0 %v6131_v42 }
  0x87   : > { %5121 = vmatpush3.bf16.msra.mxu0 %v7013_v0  ;;  %4454 = vmatprep.mubr.f32.mxu0 %v7014_v4 }
  0x88   : > { %5123 = vmatprep.subr.bf16.mxu0 %v7015_v7 }
  0x8b   : > { %5125 = vmatpush3.bf16.msra.mxu0 %v7015_v7 }
  0x8c   : > { %5127 = vmatprep.subr.bf16.mxu0 %v7016_v56 }
  0x8f   : > { %5129 = vmatpush3.bf16.msra.mxu0 %v7016_v56 }
  0x90   : > { %5131 = vmatprep.subr.bf16.mxu0 %v7017_v17 }
  0x93   : > { %5133 = vmatpush3.bf16.msra.mxu0 %v7017_v17 }
  0x94   : > { %5135 = vmatprep.subr.bf16.mxu0 %v7018_v22 }
  0x97   : > { %5137 = vmatpush3.bf16.msra.mxu0 %v7018_v22 }
  0x98   : > { %5139 = vmatprep.subr.bf16.mxu0 %v6152_v34 }
  0x9a   : > { %4455 = vmatmul.mubr.f32.vlgmr.msra.gmra.mrb[0].mxu0 %v7019_v33 }
  0x9b   : > { %5141 = vmatpush3.bf16.msra.mxu0 %v6152_v34  ;;  %4457 = vmatprep.mubr.f32.mxu0 %v7020_v53 }
  0x9c   : > { %5143 = vmatprep.subr.bf16.mxu0 %v6159_v60 }
  0x9e   : > { %4458 = vmatmul.mubr.f32.gmra.mrb[2].mxu0 %v7021_v38 }
  0x9f   : > { %5145 = vmatpush3.bf16.msra.mxu0 %v6159_v60  ;;  %4460 = vmatprep.mubr.f32.mxu0 %v7022_v47 }
  0xa0   : > { %5147 = vmatprep.subr.bf16.mxu0 %v6165_v26 }
  0xa2   : > { %4461 = vmatmul.mubr.f32.gmra.mrb[4].mxu0 %v7023_v3 }
  0xa3   : > { %5149 = vmatpush3.bf16.msra.mxu0 %v6165_v26  ;;  %4463 = vmatprep.mubr.f32.mxu0 %v7024_v12 }
  0xa4   : > { %5151 = vmatprep.subr.bf16.mxu0 %v6169_v16 }
  0xa6   : > { %4464 = vmatmul.mubr.f32.gmra.mrb[6].mxu0 %v7025_v51 }
  0xa7   : > { %5153 = vmatpush3.bf16.msra.mxu0 %v6169_v16  ;;  %4498 = vmatprep.mubr.f32.mxu0 %v5890_v29 }
  0xa8   : > { %5155 = vmatprep.subr.bf16.mxu0 %v6175_v15 }
  0xab   : > { %5157 = vmatpush3.bf16.msra.mxu0 %v6175_v15 }
  0xac   : > { %5159 = vmatprep.subr.bf16.mxu0 %v6177_v63 }
  0xaf   : > { %5161 = vmatpush3.bf16.msra.mxu0 %v6177_v63 }
  0xb0   : > { %5163 = vmatprep.subr.bf16.mxu0 %v7026_v5 }
  0xb3   : > { %5165 = vmatpush3.bf16.msra.mxu0 %v7026_v5 }
  0xb4   : > { %5167 = vmatprep.subr.bf16.mxu0 %v7027_v27 }
  0xb7   : > { %5169 = vmatpush3.bf16.msra.mxu0 %v7027_v27 }
  0xb8   : > { %5171 = vmatprep.subr.bf16.mxu0 %v5833_v10 }
  0xba   : > { %4499 = vmatmul.mubr.f32.vlgmr.msra.gmra.mrb[0].mxu0 %v5937_v48 }
  0xbb   : > { %5173 = vmatpush3.bf16.msra.mxu0 %v5833_v10  ;;  %4501 = vmatprep.mubr.f32.mxu0 %v5965_v58 }
  0xbc   : > { %5175 = vmatprep.subr.bf16.mxu0 %v5835_v13 }
  0xbe   : > { %4502 = vmatmul.mubr.f32.gmra.mrb[2].mxu0 %v6003_v8 }
  0xbf   : > { %5177 = vmatpush3.bf16.msra.mxu0 %v5835_v13  ;;  %4504 = vmatprep.mubr.f32.mxu0 %v6011_v14 }
  0xc0   : > { %5179 = vmatprep.subr.bf16.mxu0 %v7011_v40 }
  0xc2   : > { %4505 = vmatmul.mubr.f32.gmra.mrb[4].mxu0 %v6057_v9 }
  0xc3   : > { %5181 = vmatpush3.bf16.msra.mxu0 %v7011_v40  ;;  %4507 = vmatprep.mubr.f32.mxu0 %v6071_v19 }
  0xc4   : > { %5183 = vmatprep.subr.bf16.mxu0 %v7013_v0 }
  0xc6   : > { %4508 = vmatmul.mubr.f32.gmra.mrb[6].mxu0 %v6117_v44 }
  0xc7   : > { %5185 = vmatpush3.bf16.msra.mxu0 %v7013_v0  ;;  %4542 = vmatprep.mubr.f32.mxu0 %v5890_v29  ;;  %v250_v29 = vld [vmem:[%s6920_s2] sm:$0xff] }
  0xc8   : > { %5187 = vmatprep.subr.bf16.mxu0 %v7015_v7  ;;  %v1228_v42 = vand.u32 4294901760, %v250_v29 }
  0xcb   : > { %5189 = vmatpush3.bf16.msra.mxu0 %v7015_v7 }
  0xcc   : > { %5191 = vmatprep.subr.bf16.mxu0 %v7016_v56 }
  0xcf   : > { %5193 = vmatpush3.bf16.msra.mxu0 %v7016_v56 }
  0xd0   : > { %5195 = vmatprep.subr.bf16.mxu0 %v7017_v17 }
  0xd3   : > { %5197 = vmatpush3.bf16.msra.mxu0 %v7017_v17 }
  0xd4   : > { %5199 = vmatprep.subr.bf16.mxu0 %v7018_v22 }
  0xd7   : > { %5201 = vmatpush3.bf16.msra.mxu0 %v7018_v22 }
  0xda   : > { %4543 = vmatmul.mubr.f32.vlgmr.msra.gmra.mrb[0].mxu0 %v5937_v48  ;;  %v251_v48 = vld [vmem:[%s6920_s2 + $0x8] sm:$0xff] }
  0xdb   : > { %4545 = vmatprep.mubr.f32.mxu0 %v5965_v58  ;;  %v1231_v58 = vand.u32 4294901760, %v251_v48 }
  0xdd   : > { %v6368_v57 = vpack.c.bf16 %v1231_v58, %v1228_v42 }
  0xde   : > { %4546 = vmatmul.mubr.f32.gmra.mrb[2].mxu0 %v6003_v8  ;;  %v1383_v8 = vsub.f32 %v251_v48, %v1231_v58 }
  0xdf   : > { %4548 = vmatprep.mubr.f32.mxu0 %v6011_v14  ;;  %5203 = vmatprep.subr.bf16.mxu1 %v6368_v57 }
  0xe0   : > { %5419 = vmatprep.subr.bf16.mxu0 %v6368_v57  ;;  %5205 = vmatpush3.bf16.msra.mxu1 %v6368_v57 }
  0xe1   : > { %5421 = vmatpush3.bf16.msra.mxu0 %v6368_v57 }
  0xe2   : > { %4549 = vmatmul.mubr.f32.gmra.mrb[4].mxu0 %v6057_v9  ;;  %v1384_v9 = vand.u32 4294901760, %v1383_v8 }
  0xe3   : > { %4551 = vmatprep.mubr.f32.mxu0 %v6071_v19 }
  0xe4   : > { %v1385_v28 = vsub.f32 %v1383_v8, %v1384_v9 }
  0xe6   : > { %4552 = vmatmul.mubr.f32.gmra.mrb[6].mxu0 %v6117_v44  ;;  %v1376_v44 = vsub.f32 %v250_v29, %v1228_v42  ;;  %v1386_v50 = vand.u32 4294901760, %v1385_v28 }
  0xe8   : > { %v1377_v14 = vand.u32 4294901760, %v1376_v44  ;;  %v6378_v2 = vpack.c.bf16 %v1383_v8, %v1376_v44 }
  0xea   : > { %v1378_v19 = vsub.f32 %v1376_v44, %v1377_v14  ;;  %v6380_v20 = vpack.c.bf16 %v1384_v9, %v1377_v14 }
  0xec   : > { %v1379_v1 = vand.u32 4294901760, %v1378_v19 }
  0xee   : > { %v6374_v43 = vpack.c.bf16 %v1386_v50, %v1379_v1 }
  0xf0   : > { %7028 = vst [vmem:[#allocation5_spill] sm:$0xff] %v6374_v43  ;;  %5207 = vmatprep.subr.bf16.mxu1 %v6374_v43  ;;  %5423 = vmatprep.subr.bf16.mxu0 %v6374_v43 }
 0x1ad   : > { %v4544_v39 = vpop.f32.mrb[0].mxu0 }
 0x1ae   : > { %v1195_v32 = vmul.f32 0.125, %v4544_v39  ;;  %v1148_v52 = vpop.f32.mrb[1].mxu0 }
 0x1af   : > { %v1194_v45 = vmul.f32 0.125, %v1148_v52 }
 0x1b0   : > { %v1207_v49 = vsel %vm1202_vm0, %v1195_v32, 0 }
 0x1b1   : > { %v6383_v41 = vand.u32 4294901760, %v1207_v49  ;;  %v1204_v11 = vsel %vm1202_vm0, %v1194_v45, 0  ;;  %v4547_v46 = vpop.f32.mrb[2].mxu0 }
 0x1b2   : > { %v6386_v54 = vand.u32 4294901760, %v1204_v11  ;;  %v1197_v4 = vmul.f32 0.125, %v4547_v46  ;;  %v1160_v33 = vpop.f32.mrb[3].mxu0 }
 0x1b3   : > { %v6389_v53 = vsub.f32 %v1207_v49, %v6383_v41  ;;  %v1196_v38 = vmul.f32 0.125, %v1160_v33 }
 0x1b4   : > { %v6392_v47 = vsub.f32 %v1204_v11, %v6386_v54  ;;  %v1213_v3 = vsel %vm1202_vm0, %v1197_v4, 0 }
 0x1b5   : > { %v6395_v12 = vand.u32 4294901760, %v1213_v3  ;;  %v1210_v51 = vsel %vm1202_vm0, %v1196_v38, 0  ;;  %v4550_v29 = vpop.f32.mrb[4].mxu0  ;;  %v6965_v48 = vand.u32 4294901760, %v6389_v53 }
 0x1b6   : > { %v6399_v42 = vand.u32 4294901760, %v1210_v51  ;;  %v1199_v58 = vmul.f32 0.125, %v4550_v29  ;;  %v1172_v44 = vpop.f32.mrb[5].mxu0  ;;  %v6966_v8 = vand.u32 4294901760, %v6392_v47 }
 0x1b7   : > { %v6403_v14 = vsub.f32 %v1213_v3, %v6395_v12  ;;  %v1198_v9 = vmul.f32 0.125, %v1172_v44  ;;  %v1307_v19 = vsub.f32 %v6389_v53, %v6965_v48 }
 0x1b8   : > { %v6409_v28 = vsub.f32 %v1210_v51, %v6399_v42  ;;  %v1219_v1 = vsel %vm1202_vm0, %v1199_v58, 0  ;;  %v1297_v50 = vsub.f32 %v6392_v47, %v6966_v8 }
 0x1b9   : > { %v6415_v39 = vand.u32 4294901760, %v1219_v1  ;;  %v1216_v32 = vsel %vm1202_vm0, %v1198_v9, 0  ;;  %v4553_v52 = vpop.f32.mrb[6].mxu0  ;;  %v6964_v45 = vand.u32 4294901760, %v6403_v14  ;;  %v1308_v51 = vand.u32 4294901760, %v1307_v19 }
 0x1ba   : > { %v6419_v49 = vand.u32 4294901760, %v1216_v32  ;;  %v1201_v11 = vmul.f32 0.125, %v4553_v52  ;;  %v1184_v46 = vpop.f32.mrb[7].mxu0  ;;  %v1298_v4 = vand.u32 4294901760, %v1297_v50  ;;  %v1316_v33 = vand.u32 4294901760, %v6409_v28 }
 0x1bb   : > { %v6423_v38 = vsub.f32 %v1219_v1, %v6415_v39  ;;  %v1200_v3 = vmul.f32 0.125, %v1184_v46  ;;  %v1327_v29 = vsub.f32 %v6403_v14, %v6964_v45 }
 0x1bc   : > { %v1335_v58 = vsub.f32 %v1216_v32, %v6419_v49  ;;  %v1225_v44 = vsel %vm1202_vm0, %v1201_v11, 0  ;;  %4558 = vmatprep.mubr.f32.mxu1 %v1298_v4  ;;  %v1317_v9 = vsub.f32 %v6409_v28, %v1316_v33 }
 0x1bd   : > { %v6431_v52 = vand.u32 4294901760, %v1225_v44  ;;  %v1222_v50 = vsel %vm1202_vm0, %v1200_v3, 0  ;;  %4559 = vmatmul.mubr.f32.vlgmr.msra.gmra.mrb[0].mxu1 %v1308_v51  ;;  %v1346_v1 = vand.u32 4294901760, %v6423_v38  ;;  %v1328_v48 = vand.u32 4294901760, %v1327_v29 }
 0x1be   : > { %v6435_v46 = vand.u32 4294901760, %v1222_v50  ;;  %5209 = vmatpush3.bf16.msra.mxu1 %v6374_v43  ;;  %v1318_v19 = vand.u32 4294901760, %v1317_v9  ;;  %v1336_v45 = vand.u32 4294901760, %v1335_v58 }
 0x1bf   : > { %v1365_v32 = vsub.f32 %v1225_v44, %v6431_v52  ;;  %v1347_v11 = vsub.f32 %v6423_v38, %v1346_v1  ;;  %5211 = vmatprep.subr.bf16.mxu1 %v6378_v2 }
 0x1c0   : > { %v1355_v4 = vsub.f32 %v1222_v50, %v6435_v46  ;;  %4561 = vmatprep.mubr.f32.mxu1 %v1318_v19  ;;  %v1337_v3 = vsub.f32 %v1335_v58, %v1336_v45 }
 0x1c1   : > { %4562 = vmatmul.mubr.f32.gmra.mrb[2].mxu1 %v1328_v48  ;;  %v1366_v51 = vand.u32 4294901760, %v1365_v32  ;;  %v1348_v5 = vand.u32 4294901760, %v1347_v11  ;;  %v7037_v11 = vld [vmem:[#allocation15_spill] sm:$0xff] }
 0x1c2   : > { %v1338_v8 = vand.u32 4294901760, %v1337_v3  ;;  %v1356_v27 = vand.u32 4294901760, %v1355_v4 }
 0x1c3   : > { %v1367_v63 = vsub.f32 %v1365_v32, %v1366_v51 }
 0x1c4   : > { %4564 = vmatprep.mubr.f32.mxu1 %v1338_v8  ;;  %v1357_v9 = vsub.f32 %v1355_v4, %v1356_v27 }
 0x1c5   : > { %4565 = vmatmul.mubr.f32.gmra.mrb[4].mxu1 %v1348_v5  ;;  %v1368_v44 = vand.u32 4294901760, %v1367_v63  ;;  %v7029_v63 = vand.u32 4294901760, %v6392_v47  ;;  %v7030_v5 = vand.u32 4294901760, %v6389_v53 }
 0x1c6   : > { %v1358_v43 = vand.u32 4294901760, %v1357_v9  ;;  %v7038_v9 = vld [vmem:[#allocation13_spill] sm:$0xff] }
 0x1c8   : > { %4567 = vmatprep.mubr.f32.mxu1 %v1358_v43  ;;  %v7031_v43 = vand.u32 4294901760, %v6403_v14 }
 0x1c9   : > { %4568 = vmatmul.mubr.f32.gmra.mrb[6].mxu1 %v1368_v44 }
 0x1ca   : > { %4574 = vmatprep.mubr.f32.mxu1 %v6386_v54 }
 0x1cd   : > { %4575 = vmatmul.mubr.f32.vlgmr.msra.gmra.mrb[0].mxu1 %v6383_v41 }
 0x1ce   : > { %5213 = vmatpush3.bf16.msra.mxu1 %v6378_v2  ;;  %4577 = vmatprep.mubr.f32.mxu1 %v6399_v42 }
 0x1cf   : > { %5215 = vmatprep.subr.bf16.mxu1 %v6368_v57 }
 0x1d1   : > { %4578 = vmatmul.mubr.f32.gmra.mrb[2].mxu1 %v6395_v12 }
 0x1d2   : > { %4580 = vmatprep.mubr.f32.mxu1 %v6419_v49 }
 0x1d5   : > { %4581 = vmatmul.mubr.f32.gmra.mrb[4].mxu1 %v6415_v39 }
 0x1d6   : > { %4583 = vmatprep.mubr.f32.mxu1 %v6435_v46 }
 0x1d9   : > { %4584 = vmatmul.mubr.f32.gmra.mrb[6].mxu1 %v6431_v52 }
 0x1da   : > { %4590 = vmatprep.mubr.f32.mxu1 %v6392_v47 }
 0x1dd   : > { %4591 = vmatmul.mubr.f32.vlgmr.msra.gmra.mrb[0].mxu1 %v6389_v53 }
 0x1de   : > { %5217 = vmatpush3.bf16.msra.mxu1 %v6368_v57  ;;  %4593 = vmatprep.mubr.f32.mxu1 %v6409_v28 }
 0x1df   : > { %5219 = vmatprep.subr.bf16.mxu1 %v6380_v20 }
 0x1e1   : > { %4594 = vmatmul.mubr.f32.gmra.mrb[2].mxu1 %v6403_v14 }
 0x1e2   : > { %4596 = vmatprep.mubr.f32.mxu1 %v1335_v58 }
 0x1e5   : > { %4597 = vmatmul.mubr.f32.gmra.mrb[4].mxu1 %v6423_v38  ;;  %v7036_v38 = vld [vmem:[#allocation10_spill] sm:$0xff] }
 0x1e6   : > { %4599 = vmatprep.mubr.f32.mxu1 %v1355_v4 }
 0x1e9   : > { %4600 = vmatmul.mubr.f32.gmra.mrb[6].mxu1 %v1365_v32 }
 0x1ea   : > { %4606 = vmatprep.mubr.f32.mxu1 %v7029_v63 }
 0x1ed   : > { %4607 = vmatmul.mubr.f32.vlgmr.msra.gmra.mrb[0].mxu1 %v7030_v5 }
 0x1ee   : > { %5221 = vmatpush3.bf16.msra.mxu1 %v6380_v20  ;;  %4609 = vmatprep.mubr.f32.mxu1 %v1316_v33 }
 0x1ef   : > { %5223 = vmatprep.subr.bf16.mxu1 %v6368_v57 }
 0x1f1   : > { %4610 = vmatmul.mubr.f32.gmra.mrb[2].mxu1 %v7031_v43 }
 0x1f2   : > { %4612 = vmatprep.mubr.f32.mxu1 %v1336_v45 }
 0x1f5   : > { %4613 = vmatmul.mubr.f32.gmra.mrb[4].mxu1 %v1346_v1 }
 0x1f6   : > { %4615 = vmatprep.mubr.f32.mxu1 %v1356_v27  ;;  %v7032_v27 = vld [vmem:[#allocation18_spill] sm:$0xff] }
 0x1f9   : > { %4616 = vmatmul.mubr.f32.gmra.mrb[6].mxu1 %v1366_v51 }
 0x1fa   : > { %4622 = vmatprep.mubr.f32.mxu1 %v6386_v54 }
 0x1fd   : > { %4623 = vmatmul.mubr.f32.vlgmr.msra.gmra.mrb[0].mxu1 %v6383_v41 }
 0x1fe   : > { %5225 = vmatpush3.bf16.msra.mxu1 %v6368_v57  ;;  %4625 = vmatprep.mubr.f32.mxu1 %v6399_v42 }
 0x1ff   : > { %5227 = vmatprep.subr.bf16.mxu1 %v5833_v10 }
 0x201   : > { %4626 = vmatmul.mubr.f32.gmra.mrb[2].mxu1 %v6395_v12 }
 0x202   : > { %4628 = vmatprep.mubr.f32.mxu1 %v6419_v49 }
 0x205   : > { %4629 = vmatmul.mubr.f32.gmra.mrb[4].mxu1 %v6415_v39 }
 0x206   : > { %4631 = vmatprep.mubr.f32.mxu1 %v6435_v46 }
 0x209   : > { %4632 = vmatmul.mubr.f32.gmra.mrb[6].mxu1 %v6431_v52 }
 0x20a   : > { %4638 = vmatprep.mubr.f32.mxu1 %v6386_v54  ;;  %v7033_v54 = vld [vmem:[#allocation8_spill] sm:$0xff] }
 0x20d   : > { %4639 = vmatmul.mubr.f32.vlgmr.msra.gmra.mrb[0].mxu1 %v6383_v41 }
 0x20e   : > { %4641 = vmatprep.mubr.f32.mxu1 %v6399_v42  ;;  %5229 = vmatpush3.bf16.msra.mxu1 %v5833_v10 }
 0x20f   : > { %5231 = vmatprep.subr.bf16.mxu1 %v5835_v13 }
 0x211   : > { %4642 = vmatmul.mubr.f32.gmra.mrb[2].mxu1 %v6395_v12  ;;  %v7034_v12 = vld [vmem:[#allocation6_spill] sm:$0xff] }
 0x212   : > { %4644 = vmatprep.mubr.f32.mxu1 %v6419_v49  ;;  %5233 = vmatpush3.bf16.msra.mxu1 %v5835_v13 }
 0x213   : > { %5235 = vmatprep.subr.bf16.mxu1 %v7011_v40 }
 0x215   : > { %4645 = vmatmul.mubr.f32.gmra.mrb[4].mxu1 %v6415_v39  ;;  %v7035_v39 = vld [vmem:[#allocation11_spill] sm:$0xff] }
 0x216   : > { %4647 = vmatprep.mubr.f32.mxu1 %v6435_v46  ;;  %5237 = vmatpush3.bf16.msra.mxu1 %v7011_v40 }
 0x217   : > { %5239 = vmatprep.subr.bf16.mxu1 %v7013_v0 }
 0x219   : > { %4648 = vmatmul.mubr.f32.gmra.mrb[6].mxu1 %v6431_v52 }
 0x21a   : > { %5241 = vmatpush3.bf16.msra.mxu1 %v7013_v0 }
 0x21b   : > { %5243 = vmatprep.subr.bf16.mxu1 %v7015_v7 }
 0x21e   : > { %5245 = vmatpush3.bf16.msra.mxu1 %v7015_v7 }
 0x21f   : > { %5247 = vmatprep.subr.bf16.mxu1 %v7016_v56 }
 0x222   : > { %5249 = vmatpush3.bf16.msra.mxu1 %v7016_v56 }
 0x223   : > { %5251 = vmatprep.subr.bf16.mxu1 %v7017_v17 }
 0x226   : > { %5253 = vmatpush3.bf16.msra.mxu1 %v7017_v17 }
 0x227   : > { %5255 = vmatprep.subr.bf16.mxu1 %v7018_v22 }
 0x22a   : > { %5257 = vmatpush3.bf16.msra.mxu1 %v7018_v22 }
 0x22b   : > { %5259 = vmatprep.subr.bf16.mxu1 %v7032_v27 }
 0x2e0   : > { %v4640_v41 = vpop.f32.mrb[0].mxu1 }
 0x2e1   : > { %v6502_v53 = vsub.f32 %v7033_v54, %v4640_v41  ;;  %v1941_v47 = vpop.f32.mrb[1].mxu1 }
 0x2e2   : > { %v6505_v48 = vsub.f32 %v7034_v12, %v1941_v47 }
 0x2e3   : > { %v1996_v42 = vmul.f32 %v6502_v53, %v6502_v53 }
 0x2e4   : > { %v1995_v8 = vmul.f32 %v6505_v48, %v6505_v48  ;;  %v4643_v14 = vpop.f32.mrb[2].mxu1 }
 0x2e5   : > { %v6511_v28 = vand.u32 4294901760, %v1996_v42  ;;  %v6514_v45 = vsub.f32 %v7035_v39, %v4643_v14  ;;  %v1953_v49 = vpop.f32.mrb[3].mxu1  ;;  %v7039_v14 = vld [vmem:[#allocation19_spill] sm:$0xff] }
 0x2e6   : > { %v6516_v33 = vand.u32 4294901760, %v1995_v8  ;;  %v6519_v29 = vsub.f32 %v7036_v38, %v1953_v49 }
 0x2e7   : > { %v6522_v58 = vsub.f32 %v1996_v42, %v6511_v28  ;;  %v1998_v52 = vmul.f32 %v6514_v45, %v6514_v45 }
 0x2e8   : > { %v6527_v50 = vsub.f32 %v1995_v8, %v6516_v33  ;;  %v1997_v1 = vmul.f32 %v6519_v29, %v6519_v29  ;;  %v4646_v46 = vpop.f32.mrb[4].mxu1 }
 0x2e9   : > { %v6972_v19 = vand.u32 4294901760, %v6522_v58  ;;  %v6532_v32 = vand.u32 4294901760, %v1998_v52  ;;  %v6535_v4 = vsub.f32 %v7037_v11, %v4646_v46  ;;  %v1965_v3 = vpop.f32.mrb[5].mxu1 }
 0x2ea   : > { %v6537_v51 = vand.u32 4294901760, %v1997_v1  ;;  %v6540_v44 = vsub.f32 %v7038_v9, %v1965_v3  ;;  %v6973_v63 = vand.u32 4294901760, %v6527_v50 }
 0x2eb   : > { %v2097_v5 = vsub.f32 %v6522_v58, %v6972_v19  ;;  %v6547_v43 = vsub.f32 %v1998_v52, %v6532_v32  ;;  %v2000_v41 = vmul.f32 %v6535_v4, %v6535_v4 }
 0x2ec   : > { %v6552_v54 = vsub.f32 %v1997_v1, %v6537_v51  ;;  %v1999_v47 = vmul.f32 %v6540_v44, %v6540_v44  ;;  %v4649_v12 = vpop.f32.mrb[6].mxu1  ;;  %v2087_v42 = vsub.f32 %v6527_v50, %v6973_v63  ;;  %v7041_v1 = vld [vmem:[#allocation16_spill] sm:$0xff] }
 0x2ed   : > { %v6559_v8 = vand.u32 4294901760, %v2000_v41  ;;  %v6562_v39 = vsub.f32 %v7039_v14, %v4649_v12  ;;  %v1977_v49 = vpop.f32.mrb[7].mxu1  ;;  %v6974_v38 = vand.u32 4294901760, %v6547_v43  ;;  %v2098_v9 = vand.u32 4294901760, %v2097_v5 }
 0x2ee   : > { %v6565_v52 = vand.u32 4294901760, %v1999_v47  ;;  %v6568_v46 = vsub.f32 %v7041_v1, %v1977_v49  ;;  %v2088_v11 = vand.u32 4294901760, %v2087_v42  ;;  %v6976_v3 = vand.u32 4294901760, %v6552_v54 }
 0x2ef   : > { %7040 = vst [vmem:[#allocation20_spill] sm:$0xff] %v6562_v39  ;;  %v6572_v19 = vsub.f32 %v2000_v41, %v6559_v8  ;;  %v2002_v63 = vmul.f32 %v6562_v39, %v6562_v39  ;;  %v2117_v12 = vsub.f32 %v6547_v43, %v6974_v38 }
 0x2f0   : > { %7042 = vst [vmem:[#allocation7_spill] sm:$0xff] %v6568_v46  ;;  %v6580_v14 = vsub.f32 %v1999_v47, %v6565_v52  ;;  %v2001_v49 = vmul.f32 %v6568_v46, %v6568_v46  ;;  %4682 = vmatprep.mubr.f32.mxu1 %v2088_v11  ;;  %v2107_v5 = vsub.f32 %v6552_v54, %v6976_v3 }
 0x2f1   : > { %v6587_v41 = vand.u32 4294901760, %v2002_v63  ;;  %4683 = vmatmul.mubr.f32.vlgmr.msra.gmra.mrb[8].mxu1 %v2098_v9  ;;  %v2136_v42 = vand.u32 4294901760, %v6572_v19  ;;  %v2118_v11 = vand.u32 4294901760, %v2117_v12 }
 0x2f2   : > { %v6590_v1 = vand.u32 4294901760, %v2001_v49  ;;  %5261 = vmatpush3.bf16.msra.mxu1 %v7032_v27  ;;  %v2108_v38 = vand.u32 4294901760, %v2107_v5  ;;  %v2126_v47 = vand.u32 4294901760, %v6580_v14 }
 0x2f3   : > { %v6595_v39 = vsub.f32 %v2002_v63, %v6587_v41  ;;  %5263 = vmatprep.subr.bf16.mxu1 %v6048_v6  ;;  %v2137_v3 = vsub.f32 %v6572_v19, %v2136_v42 }
 0x2f4   : > { %v6602_v9 = vsub.f32 %v2001_v49, %v6590_v1  ;;  %4685 = vmatprep.mubr.f32.mxu1 %v2108_v38  ;;  %v2127_v27 = vsub.f32 %v6580_v14, %v2126_v47 }
 0x2f5   : > { %4686 = vmatmul.mubr.f32.gmra.mrb[10].mxu1 %v2118_v11  ;;  %v2156_v5 = vand.u32 4294901760, %v6595_v39  ;;  %v2138_v46 = vand.u32 4294901760, %v2137_v3 }
 0x2f6   : > { %5265 = vmatpush3.bf16.msra.mxu1 %v6048_v6  ;;  %v2128_v63 = vand.u32 4294901760, %v2127_v27  ;;  %v2146_v12 = vand.u32 4294901760, %v6602_v9 }
 0x2f7   : > { %5267 = vmatprep.subr.bf16.mxu1 %v6076_v18  ;;  %v2157_v49 = vsub.f32 %v6595_v39, %v2156_v5 }
 0x2f8   : > { %4688 = vmatprep.mubr.f32.mxu1 %v2128_v63  ;;  %v2147_v38 = vsub.f32 %v6602_v9, %v2146_v12 }
 0x2f9   : > { %4689 = vmatmul.mubr.f32.gmra.mrb[12].mxu1 %v2138_v46  ;;  %v2158_v6 = vand.u32 4294901760, %v2157_v49 }
 0x2fa   : > { %5269 = vmatpush3.bf16.msra.mxu1 %v6076_v18  ;;  %v2148_v11 = vand.u32 4294901760, %v2147_v38  ;;  %v7043_v18 = vand.u32 4294901760, %v6527_v50 }
 0x2fb   : > { %5271 = vmatprep.subr.bf16.mxu1 %v6193_v61 }
 0x2fc   : > { %4691 = vmatprep.mubr.f32.mxu1 %v2148_v11 }
 0x2fd   : > { %4692 = vmatmul.mubr.f32.gmra.mrb[14].mxu1 %v2158_v6 }
 0x2fe   : > { %5273 = vmatpush3.bf16.msra.mxu1 %v6193_v61  ;;  %4726 = vmatprep.mubr.f32.mxu1 %v6516_v33  ;;  %v7044_v61 = vand.u32 4294901760, %v6522_v58 }
 0x2ff   : > { %5275 = vmatprep.subr.bf16.mxu1 %v6197_v62 }
 0x302   : > { %5277 = vmatpush3.bf16.msra.mxu1 %v6197_v62  ;;  %v7045_v62 = vand.u32 4294901760, %v6552_v54 }
 0x303   : > { %5279 = vmatprep.subr.bf16.mxu1 %v6202_v55 }
 0x306   : > { %5281 = vmatpush3.bf16.msra.mxu1 %v6202_v55  ;;  %v7046_v55 = vand.u32 4294901760, %v6547_v43 }
 0x307   : > { %5283 = vmatprep.subr.bf16.mxu1 %v6210_v21 }
 0x30a   : > { %5285 = vmatpush3.bf16.msra.mxu1 %v6210_v21 }
 0x30b   : > { %5287 = vmatprep.subr.bf16.mxu1 %v6214_v37 }
 0x30e   : > { %5289 = vmatpush3.bf16.msra.mxu1 %v6214_v37 }
 0x30f   : > { %5291 = vmatprep.subr.bf16.mxu1 %v6220_v23 }
 0x311   : > { %4727 = vmatmul.mubr.f32.vlgmr.msra.gmra.mrb[8].mxu1 %v6511_v28 }
 0x312   : > { %4729 = vmatprep.mubr.f32.mxu1 %v6537_v51  ;;  %5293 = vmatpush3.bf16.msra.mxu1 %v6220_v23 }
 0x313   : > { %5295 = vmatprep.subr.bf16.mxu1 %v6226_v59 }
 0x315   : > { %4730 = vmatmul.mubr.f32.gmra.mrb[10].mxu1 %v6532_v32 }
 0x316   : > { %4732 = vmatprep.mubr.f32.mxu1 %v6565_v52  ;;  %5297 = vmatpush3.bf16.msra.mxu1 %v6226_v59 }
 0x317   : > { %5299 = vmatprep.subr.bf16.mxu1 %v6234_v24 }
 0x319   : > { %4733 = vmatmul.mubr.f32.gmra.mrb[12].mxu1 %v6559_v8 }
 0x31a   : > { %4735 = vmatprep.mubr.f32.mxu1 %v6590_v1  ;;  %5301 = vmatpush3.bf16.msra.mxu1 %v6234_v24 }
 0x31b   : > { %5303 = vmatprep.subr.bf16.mxu1 %v6242_v25 }
 0x31d   : > { %4736 = vmatmul.mubr.f32.gmra.mrb[14].mxu1 %v6587_v41 }
 0x31e   : > { %5305 = vmatpush3.bf16.msra.mxu1 %v6242_v25  ;;  %4770 = vmatprep.mubr.f32.mxu1 %v6527_v50 }
 0x31f   : > { %5307 = vmatprep.subr.bf16.mxu1 %v6250_v30 }
 0x322   : > { %5309 = vmatpush3.bf16.msra.mxu1 %v6250_v30 }
 0x323   : > { %5311 = vmatprep.subr.bf16.mxu1 %v6258_v31 }
 0x326   : > { %5313 = vmatpush3.bf16.msra.mxu1 %v6258_v31 }
 0x327   : > { %5315 = vmatprep.subr.bf16.mxu1 %v6264_v35 }
 0x32a   : > { %5317 = vmatpush3.bf16.msra.mxu1 %v6264_v35 }
 0x32b   : > { %5319 = vmatprep.subr.bf16.mxu1 %v6270_v36 }
 0x32e   : > { %5321 = vmatpush3.bf16.msra.mxu1 %v6270_v36 }
 0x32f   : > { %5323 = vmatprep.subr.bf16.mxu1 %v5833_v10 }
 0x331   : > { %4771 = vmatmul.mubr.f32.vlgmr.msra.gmra.mrb[8].mxu1 %v6522_v58 }
 0x332   : > { %4773 = vmatprep.mubr.f32.mxu1 %v6552_v54  ;;  %5325 = vmatpush3.bf16.msra.mxu1 %v5833_v10 }
 0x333   : > { %5327 = vmatprep.subr.bf16.mxu1 %v5835_v13 }
 0x335   : > { %4774 = vmatmul.mubr.f32.gmra.mrb[10].mxu1 %v6547_v43 }
 0x336   : > { %4776 = vmatprep.mubr.f32.mxu1 %v6580_v14  ;;  %5329 = vmatpush3.bf16.msra.mxu1 %v5835_v13 }
 0x337   : > { %5331 = vmatprep.subr.bf16.mxu1 %v7011_v40 }
 0x339   : > { %4777 = vmatmul.mubr.f32.gmra.mrb[12].mxu1 %v6572_v19 }
 0x33a   : > { %4779 = vmatprep.mubr.f32.mxu1 %v6602_v9  ;;  %5333 = vmatpush3.bf16.msra.mxu1 %v7011_v40 }
 0x33b   : > { %5335 = vmatprep.subr.bf16.mxu1 %v7013_v0 }
 0x33d   : > { %4780 = vmatmul.mubr.f32.gmra.mrb[14].mxu1 %v6595_v39 }
 0x33e   : > { %5337 = vmatpush3.bf16.msra.mxu1 %v7013_v0  ;;  %4814 = vmatprep.mubr.f32.mxu1 %v7043_v18 }
 0x33f   : > { %5339 = vmatprep.subr.bf16.mxu1 %v7015_v7 }
 0x342   : > { %5341 = vmatpush3.bf16.msra.mxu1 %v7015_v7 }
 0x343   : > { %5343 = vmatprep.subr.bf16.mxu1 %v7016_v56 }
 0x346   : > { %5345 = vmatpush3.bf16.msra.mxu1 %v7016_v56 }
 0x347   : > { %5347 = vmatprep.subr.bf16.mxu1 %v7017_v17 }
 0x34a   : > { %5349 = vmatpush3.bf16.msra.mxu1 %v7017_v17 }
 0x34b   : > { %5351 = vmatprep.subr.bf16.mxu1 %v7018_v22 }
 0x34e   : > { %5353 = vmatpush3.bf16.msra.mxu1 %v7018_v22 }
 0x34f   : > { %5355 = vmatprep.subr.bf16.mxu1 %v6152_v34 }
 0x351   : > { %4815 = vmatmul.mubr.f32.vlgmr.msra.gmra.mrb[8].mxu1 %v7044_v61  ;;  %v7050_v61 = vld [vmem:[#allocation5_spill] sm:$0xff] }
 0x352   : > { %4817 = vmatprep.mubr.f32.mxu1 %v7045_v62  ;;  %5357 = vmatpush3.bf16.msra.mxu1 %v6152_v34  ;;  %v7047_v34 = vld [vmem:[#allocation21_spill] sm:$0xff] }
 0x353   : > { %5359 = vmatprep.subr.bf16.mxu1 %v6159_v60 }
 0x355   : > { %4818 = vmatmul.mubr.f32.gmra.mrb[10].mxu1 %v7046_v55 }
 0x356   : > { %4820 = vmatprep.mubr.f32.mxu1 %v2126_v47  ;;  %5361 = vmatpush3.bf16.msra.mxu1 %v6159_v60  ;;  %v7048_v60 = vld [vmem:[#allocation22_spill] sm:$0xff] }
 0x357   : > { %5363 = vmatprep.subr.bf16.mxu1 %v6165_v26 }
 0x359   : > { %4821 = vmatmul.mubr.f32.gmra.mrb[12].mxu1 %v2136_v42 }
 0x35a   : > { %4823 = vmatprep.mubr.f32.mxu1 %v2146_v12  ;;  %5365 = vmatpush3.bf16.msra.mxu1 %v6165_v26  ;;  %v7049_v26 = vld [vmem:[#allocation23_spill] sm:$0xff] }
 0x35b   : > { %5367 = vmatprep.subr.bf16.mxu1 %v6169_v16 }
 0x35d   : > { %4824 = vmatmul.mubr.f32.gmra.mrb[14].mxu1 %v2156_v5 }
 0x35e   : > { %5369 = vmatpush3.bf16.msra.mxu1 %v6169_v16  ;;  %4858 = vmatprep.mubr.f32.mxu1 %v6516_v33 }
 0x35f   : > { %5371 = vmatprep.subr.bf16.mxu1 %v6175_v15 }
 0x362   : > { %5373 = vmatpush3.bf16.msra.mxu1 %v6175_v15 }
 0x363   : > { %5375 = vmatprep.subr.bf16.mxu1 %v7047_v34 }
 0x366   : > { %5377 = vmatpush3.bf16.msra.mxu1 %v7047_v34 }
 0x367   : > { %5379 = vmatprep.subr.bf16.mxu1 %v7048_v60 }
 0x36a   : > { %5381 = vmatpush3.bf16.msra.mxu1 %v7048_v60 }
 0x36b   : > { %5383 = vmatprep.subr.bf16.mxu1 %v7049_v26 }
 0x36e   : > { %5385 = vmatpush3.bf16.msra.mxu1 %v7049_v26 }
 0x36f   : > { %5387 = vmatprep.subr.bf16.mxu1 %v5833_v10 }
 0x371   : > { %4859 = vmatmul.mubr.f32.vlgmr.msra.gmra.mrb[8].mxu1 %v6511_v28 }
 0x372   : > { %4861 = vmatprep.mubr.f32.mxu1 %v6537_v51  ;;  %5389 = vmatpush3.bf16.msra.mxu1 %v5833_v10 }
 0x373   : > { %5391 = vmatprep.subr.bf16.mxu1 %v5835_v13 }
 0x375   : > { %4862 = vmatmul.mubr.f32.gmra.mrb[10].mxu1 %v6532_v32 }
 0x376   : > { %4864 = vmatprep.mubr.f32.mxu1 %v6565_v52  ;;  %5393 = vmatpush3.bf16.msra.mxu1 %v5835_v13 }
 0x377   : > { %5395 = vmatprep.subr.bf16.mxu1 %v7011_v40 }
 0x379   : > { %4865 = vmatmul.mubr.f32.gmra.mrb[12].mxu1 %v6559_v8 }
 0x37a   : > { %4867 = vmatprep.mubr.f32.mxu1 %v6590_v1  ;;  %5397 = vmatpush3.bf16.msra.mxu1 %v7011_v40 }
 0x37b   : > { %5399 = vmatprep.subr.bf16.mxu1 %v7013_v0 }
 0x37d   : > { %4868 = vmatmul.mubr.f32.gmra.mrb[14].mxu1 %v6587_v41 }
 0x37e   : > { %5401 = vmatpush3.bf16.msra.mxu1 %v7013_v0  ;;  %4902 = vmatprep.mubr.f32.mxu1 %v6516_v33 }
 0x37f   : > { %5403 = vmatprep.subr.bf16.mxu1 %v7015_v7 }
 0x382   : > { %5405 = vmatpush3.bf16.msra.mxu1 %v7015_v7 }
 0x383   : > { %5407 = vmatprep.subr.bf16.mxu1 %v7016_v56 }
 0x386   : > { %5409 = vmatpush3.bf16.msra.mxu1 %v7016_v56 }
 0x387   : > { %5411 = vmatprep.subr.bf16.mxu1 %v7017_v17 }
 0x38a   : > { %5413 = vmatpush3.bf16.msra.mxu1 %v7017_v17 }
 0x38b   : > { %5415 = vmatprep.subr.bf16.mxu1 %v7018_v22 }
 0x38e   : > { %5417 = vmatpush3.bf16.msra.mxu1 %v7018_v22 }
 0x38f   : > { %5442 = vmatprep.subr.bf16.mxu1 %v6368_v57 }
 0x391   : > { %4903 = vmatmul.mubr.f32.vlgmr.msra.gmra.mrb[8].mxu1 %v6511_v28 }
 0x392   : > { %4905 = vmatprep.mubr.f32.mxu1 %v6537_v51  ;;  %5443 = vmatpush3.bf16.msra.mxu1 %v6368_v57 }
 0x395   : > { %4906 = vmatmul.mubr.f32.gmra.mrb[10].mxu1 %v6532_v32 }
 0x396   : > { %4908 = vmatprep.mubr.f32.mxu1 %v6565_v52 }
 0x399   : > { %4909 = vmatmul.mubr.f32.gmra.mrb[12].mxu1 %v6559_v8 }
 0x39a   : > { %4911 = vmatprep.mubr.f32.mxu1 %v6590_v1 }
 0x39d   : > { %4912 = vmatmul.mubr.f32.gmra.mrb[14].mxu1 %v6587_v41 }
 0x464   : > { %v4904_v10 = vpop.f32.mrb[8].mxu1 }
 0x465   : > { %v2946_v13 = vmul.f32 0.14285715, %v4904_v10  ;;  %v2899_v16 = vpop.f32.mrb[9].mxu1 }
 0x466   : > { %v2945_v15 = vmul.f32 0.14285715, %v2899_v16 }
 0x467   : > { %v2957_v21 = vsel %vm1202_vm0, %v2946_v13, 0 }
 0x468   : > { %v6743_v37 = vand.u32 4294901760, %v2957_v21  ;;  %v2954_v23 = vsel %vm1202_vm0, %v2945_v15, 0  ;;  %v4907_v59 = vpop.f32.mrb[10].mxu1 }
 0x469   : > { %v6746_v24 = vand.u32 4294901760, %v2954_v23  ;;  %v2948_v25 = vmul.f32 0.14285715, %v4907_v59  ;;  %v2911_v30 = vpop.f32.mrb[11].mxu1 }
 0x46a   : > { %v6749_v31 = vsub.f32 %v2957_v21, %v6743_v37  ;;  %v2947_v35 = vmul.f32 0.14285715, %v2911_v30 }
 0x46b   : > { %v6752_v36 = vsub.f32 %v2954_v23, %v6746_v24  ;;  %v2963_v40 = vsel %vm1202_vm0, %v2948_v25, 0 }
 0x46c   : > { %v3056_v0 = vand.u32 4294901760, %v6749_v31  ;;  %v6756_v7 = vand.u32 4294901760, %v2963_v40  ;;  %v2960_v56 = vsel %vm1202_vm0, %v2947_v35, 0  ;;  %v4910_v17 = vpop.f32.mrb[12].mxu1 }
 0x46d   : > { %v6759_v22 = vand.u32 4294901760, %v2960_v56  ;;  %v2950_v28 = vmul.f32 0.14285715, %v4910_v17  ;;  %v2923_v33 = vpop.f32.mrb[13].mxu1  ;;  %v3046_v58 = vand.u32 4294901760, %v6752_v36 }
 0x46e   : > { %v3057_v50 = vsub.f32 %v6749_v31, %v3056_v0  ;;  %v6766_v19 = vsub.f32 %v2963_v40, %v6756_v7  ;;  %v2949_v32 = vmul.f32 0.14285715, %v2923_v33 }
 0x46f   : > { %v6769_v51 = vsub.f32 %v2960_v56, %v6759_v22  ;;  %v2969_v43 = vsel %vm1202_vm0, %v2950_v28, 0  ;;  %v3047_v54 = vsub.f32 %v6752_v36, %v3046_v58 }
 0x470   : > { %v6775_v8 = vand.u32 4294901760, %v2969_v43  ;;  %v2966_v39 = vsel %vm1202_vm0, %v2949_v32, 0  ;;  %v4913_v52 = vpop.f32.mrb[14].mxu1  ;;  %v3076_v46 = vand.u32 4294901760, %v6766_v19  ;;  %v3058_v47 = vand.u32 4294901760, %v3057_v50 }
 0x471   : > { %v6779_v3 = vand.u32 4294901760, %v2966_v39  ;;  %v2952_v14 = vmul.f32 0.14285715, %v4913_v52  ;;  %v2935_v41 = vpop.f32.mrb[15].mxu1  ;;  %v3048_v42 = vand.u32 4294901760, %v3047_v54  ;;  %v3066_v1 = vand.u32 4294901760, %v6769_v51 }
 0x472   : > { %v3095_v9 = vsub.f32 %v2969_v43, %v6775_v8  ;;  %v2951_v27 = vmul.f32 0.14285715, %v2935_v41  ;;  %v3077_v5 = vsub.f32 %v6766_v19, %v3076_v46  ;;  %v3874_v32 = vld [vmem:[%s6921_s3] ss:$0 sm:$0xff] }
 0x473   : > { %v3085_v63 = vsub.f32 %v2966_v39, %v6779_v3  ;;  %v2975_v12 = vsel %vm1202_vm0, %v2952_v14, 0  ;;  %4918 = vmatprep.mubr.f32.mxu0 %v3048_v42  ;;  %v3067_v49 = vsub.f32 %v6769_v51, %v3066_v1  ;;  %v3875_v52 = vld [vmem:[%s6922_s4] ss:$0 sm:$0xff] }
 0x474   : > { %v6789_v38 = vand.u32 4294901760, %v2975_v12  ;;  %v2972_v11 = vsel %vm1202_vm0, %v2951_v27, 0  ;;  %4919 = vmatmul.mubr.f32.vlgmr.msra.gmra.mrb[8].mxu0 %v3058_v47  ;;  %v3096_v6 = vand.u32 4294901760, %v3095_v9  ;;  %v3078_v60 = vand.u32 4294901760, %v3077_v5 }
 0x475   : > { %v6792_v18 = vand.u32 4294901760, %v2972_v11  ;;  %5425 = vmatpush3.bf16.msra.mxu0 %v7050_v61  ;;  %v3068_v62 = vand.u32 4294901760, %v3067_v49  ;;  %v3086_v55 = vand.u32 4294901760, %v3085_v63 }
 0x476   : > { %v3115_v34 = vsub.f32 %v2975_v12, %v6789_v38  ;;  %v3097_v26 = vsub.f32 %v3095_v9, %v3096_v6  ;;  %5427 = vmatprep.subr.bf16.mxu0 %v6378_v2 }
 0x477   : > { %v3105_v10 = vsub.f32 %v2972_v11, %v6792_v18  ;;  %4921 = vmatprep.mubr.f32.mxu0 %v3068_v62  ;;  %v3087_v13 = vsub.f32 %v3085_v63, %v3086_v55  ;;  %v7051_v62 = vld [vmem:[#allocation20_spill] sm:$0xff] }
 0x478   : > { %v3116_v16 = vand.u32 4294901760, %v3115_v34  ;;  %4922 = vmatmul.mubr.f32.gmra.mrb[10].mxu0 %v3078_v60  ;;  %v3098_v59 = vand.u32 4294901760, %v3097_v26  ;;  %v7052_v60 = vld [vmem:[#allocation7_spill] sm:$0xff] }
 0x479   : > { %v3088_v15 = vand.u32 4294901760, %v3087_v13  ;;  %v3106_v21 = vand.u32 4294901760, %v3105_v10 }
 0x47a   : > { %v3117_v23 = vsub.f32 %v3115_v34, %v3116_v16 }
 0x47b   : > { %4924 = vmatprep.mubr.f32.mxu0 %v3088_v15  ;;  %v3107_v25 = vsub.f32 %v3105_v10, %v3106_v21 }
 0x47c   : > { %4925 = vmatmul.mubr.f32.gmra.mrb[12].mxu0 %v3098_v59  ;;  %v3118_v35 = vand.u32 4294901760, %v3117_v23 }
 0x47d   : > { %4934 = vmatprep.mubr.f32.mxu0 %v6746_v24  ;;  %v3108_v30 = vand.u32 4294901760, %v3107_v25 }
 0x47f   : > { %4927 = vmatprep.mubr.f32.mxu1 %v3108_v30 }
 0x480   : > { %4928 = vmatmul.mubr.f32.vlgmr.msra.gmra.mrb[16].mxu1 %v3118_v35  ;;  %4935 = vmatmul.mubr.f32.vlgmr.msra.gmra.mrb[8].mxu0 %v6743_v37 }
 0x481   : > { %5429 = vmatpush3.bf16.msra.mxu0 %v6378_v2  ;;  %4937 = vmatprep.mubr.f32.mxu0 %v6759_v22 }
 0x482   : > { %5431 = vmatprep.subr.bf16.mxu0 %v6368_v57 }
 0x484   : > { %4938 = vmatmul.mubr.f32.gmra.mrb[10].mxu0 %v6756_v7 }
 0x485   : > { %4940 = vmatprep.mubr.f32.mxu0 %v6779_v3 }
 0x488   : > { %4941 = vmatmul.mubr.f32.gmra.mrb[12].mxu0 %v6775_v8 }
 0x489   : > { %4943 = vmatprep.mubr.f32.mxu0 %v6792_v18 }
 0x48c   : > { %4944 = vmatmul.mubr.f32.gmra.mrb[14].mxu0 %v6789_v38 }
 0x48d   : > { %4950 = vmatprep.mubr.f32.mxu0 %v6752_v36 }
 0x490   : > { %4951 = vmatmul.mubr.f32.vlgmr.msra.gmra.mrb[8].mxu0 %v6749_v31 }
 0x491   : > { %5433 = vmatpush3.bf16.msra.mxu0 %v6368_v57  ;;  %4953 = vmatprep.mubr.f32.mxu0 %v6769_v51 }
 0x492   : > { %5435 = vmatprep.subr.bf16.mxu0 %v6380_v20 }
 0x494   : > { %4954 = vmatmul.mubr.f32.gmra.mrb[10].mxu0 %v6766_v19 }
 0x495   : > { %4956 = vmatprep.mubr.f32.mxu0 %v3085_v63 }
 0x498   : > { %4957 = vmatmul.mubr.f32.gmra.mrb[12].mxu0 %v3095_v9 }
 0x499   : > { %4959 = vmatprep.mubr.f32.mxu0 %v3105_v10 }
 0x49c   : > { %4960 = vmatmul.mubr.f32.gmra.mrb[14].mxu0 %v3115_v34 }
 0x49d   : > { %4966 = vmatprep.mubr.f32.mxu0 %v3046_v58 }
 0x4a0   : > { %4967 = vmatmul.mubr.f32.vlgmr.msra.gmra.mrb[8].mxu0 %v3056_v0 }
 0x4a1   : > { %5437 = vmatpush3.bf16.msra.mxu0 %v6380_v20  ;;  %4969 = vmatprep.mubr.f32.mxu0 %v3066_v1 }
 0x4a2   : > { %5439 = vmatprep.subr.bf16.mxu0 %v6368_v57 }
 0x4a4   : > { %4970 = vmatmul.mubr.f32.gmra.mrb[10].mxu0 %v3076_v46 }
 0x4a5   : > { %4972 = vmatprep.mubr.f32.mxu0 %v3086_v55 }
 0x4a8   : > { %4973 = vmatmul.mubr.f32.gmra.mrb[12].mxu0 %v3096_v6 }
 0x4a9   : > { %4975 = vmatprep.mubr.f32.mxu0 %v3106_v21 }
 0x4ac   : > { %4976 = vmatmul.mubr.f32.gmra.mrb[14].mxu0 %v3116_v16 }
 0x4ad   : > { %4982 = vmatprep.mubr.f32.mxu0 %v6746_v24 }
 0x4b0   : > { %4983 = vmatmul.mubr.f32.vlgmr.msra.gmra.mrb[8].mxu0 %v6743_v37 }
 0x4b1   : > { %5441 = vmatpush3.bf16.msra.mxu0 %v6368_v57  ;;  %4985 = vmatprep.mubr.f32.mxu0 %v6759_v22 }
 0x4b4   : > { %4986 = vmatmul.mubr.f32.gmra.mrb[10].mxu0 %v6756_v7 }
 0x4b5   : > { %4988 = vmatprep.mubr.f32.mxu0 %v6779_v3 }
 0x4b8   : > { %4989 = vmatmul.mubr.f32.gmra.mrb[12].mxu0 %v6775_v8 }
 0x4b9   : > { %4991 = vmatprep.mubr.f32.mxu0 %v6792_v18 }
 0x4bc   : > { %4992 = vmatmul.mubr.f32.gmra.mrb[14].mxu0 %v6789_v38 }
 0x4bd   : > { %4998 = vmatprep.mubr.f32.mxu0 %v6746_v24 }
 0x4c0   : > { %4999 = vmatmul.mubr.f32.vlgmr.msra.gmra.mrb[8].mxu0 %v6743_v37 }
 0x4c1   : > { %5001 = vmatprep.mubr.f32.mxu0 %v6759_v22 }
 0x4c4   : > { %5002 = vmatmul.mubr.f32.gmra.mrb[10].mxu0 %v6756_v7 }
 0x4c5   : > { %5004 = vmatprep.mubr.f32.mxu0 %v6779_v3 }
 0x4c8   : > { %5005 = vmatmul.mubr.f32.gmra.mrb[12].mxu0 %v6775_v8 }
 0x4c9   : > { %5007 = vmatprep.mubr.f32.mxu0 %v6792_v18 }
 0x4cc   : > { %5008 = vmatmul.mubr.f32.gmra.mrb[14].mxu0 %v6789_v38 }
 0x553   : > { %v4929_v57 = vpop.f32.mrb[16].mxu1 }
 0x554   : > { %v3110_v2 = vpop.f32.mrb[17].mxu1  ;;  %v3121_v33 = vadd.f32 1e-08, %v4929_v57 }
 0x555   : > { %v3111_v58 = vadd.f32 1e-08, %v3110_v2 }
 0x593   : > { %v5000_v20 = vpop.f32.mrb[8].mxu0 }
 0x594   : > { %v5444_v31 = vadd.f32 1e-08, %v5000_v20  ;;  %v3691_v24 = vpop.f32.mrb[9].mxu0 }
 0x595   : > { %v5445_v36 = vadd.f32 1e-08, %v3691_v24 }
 0x596   : > { %5653 = vrsqrt.f32 %v5444_v31 }
 0x597   : > { %5655 = vrsqrt.f32 %v5445_v36  ;;  %v5003_v37 = vpop.f32.mrb[10].mxu0 }
 0x598   : > { %v5446_v40 = vadd.f32 1e-08, %v5003_v37  ;;  %v3703_v0 = vpop.f32.mrb[11].mxu0 }
 0x599   : > { %v5447_v7 = vadd.f32 1e-08, %v3703_v0 }
 0x59a   : > { %5657 = vrsqrt.f32 %v5446_v40 }
 0x59b   : > { %5659 = vrsqrt.f32 %v5447_v7  ;;  %v5006_v56 = vpop.f32.mrb[12].mxu0 }
 0x59c   : > { %v5448_v17 = vadd.f32 1e-08, %v5006_v56  ;;  %v3715_v22 = vpop.f32.mrb[13].mxu0 }
 0x59d   : > { %v5449_v28 = vadd.f32 1e-08, %v3715_v22 }
 0x59e   : > { %5661 = vrsqrt.f32 %v5448_v17 }
 0x59f   : > { %5663 = vrsqrt.f32 %v5449_v28  ;;  %v5009_v50 = vpop.f32.mrb[14].mxu0 }
 0x5a0   : > { %v5654_v19 = vpop.eup %5653  ;;  %v5451_v51 = vadd.f32 %v5009_v50, %v3121_v33  ;;  %v3727_v43 = vpop.f32.mrb[15].mxu0 }
 0x5a1   : > { %v5656_v54 = vpop.eup %5655  ;;  %v3746_v8 = vmul.f32 %v5654_v19, %v6502_v53  ;;  %v5453_v39 = vadd.f32 %v3727_v43, %v3111_v58 }
 0x5a2   : > { %v3745_v46 = vmul.f32 %v5656_v54, %v6505_v48  ;;  %5665 = vrsqrt.f32 %v5451_v51 }
 0x5a3   : > { %v3761_v3 = vmul.f32 %v3874_v32, %v3746_v8  ;;  %5667 = vrsqrt.f32 %v5453_v39 }
 0x5a4   : > { %v5658_v14 = vpop.eup %5657  ;;  %v3760_v41 = vmul.f32 %v3874_v32, %v3745_v46 }
 0x5a5   : > { %v5660_v42 = vpop.eup %5659  ;;  %v3776_v1 = vadd.f32 %v3875_v52, %v3761_v3  ;;  %v3748_v47 = vmul.f32 %v5658_v14, %v6514_v45 }
 0x5a6   : > { %v3775_v9 = vadd.f32 %v3875_v52, %v3760_v41  ;;  %v3747_v27 = vmul.f32 %v5660_v42, %v6519_v29 }
 0x5a7   : > { %3784 = vst [vmem:[%s6852_s26 + $0x8] sm:$0xff] %v3776_v1  ;;  %v3763_v53 = vmul.f32 %v3874_v32, %v3748_v47 }
 0x5a8   : > { %v5662_v48 = vpop.eup %5661  ;;  %3783 = vst [vmem:[%s6852_s26] sm:$0xff] %v3775_v9  ;;  %v3762_v5 = vmul.f32 %v3874_v32, %v3747_v27 }
 0x5a9   : > { %v5664_v63 = vpop.eup %5663  ;;  %v3778_v12 = vadd.f32 %v3875_v52, %v3763_v53  ;;  %v3750_v45 = vmul.f32 %v5662_v48, %v6535_v4 }
 0x5aa   : > { %v3777_v49 = vadd.f32 %v3875_v52, %v3762_v5  ;;  %v3749_v29 = vmul.f32 %v5664_v63, %v6540_v44 }
 0x5ab   : > { %3786 = vst [vmem:[%s6852_s26 + $0x18] sm:$0xff] %v3778_v12  ;;  %v3765_v38 = vmul.f32 %v3874_v32, %v3750_v45 }
 0x5ac   : > { %v5666_v11 = vpop.eup %5665  ;;  %3785 = vst [vmem:[%s6852_s26 + $0x10] sm:$0xff] %v3777_v49  ;;  %v3764_v6 = vmul.f32 %v3874_v32, %v3749_v29 }
 0x5ad   : > { %v5668_v18 = vpop.eup %5667  ;;  %v3780_v61 = vadd.f32 %v3875_v52, %v3765_v38  ;;  %v3752_v55 = vmul.f32 %v5666_v11, %v7051_v62 }
 0x5ae   : > { %v3779_v34 = vadd.f32 %v3875_v52, %v3764_v6  ;;  %v3751_v26 = vmul.f32 %v5668_v18, %v7052_v60 }
 0x5af   : > { %3788 = vst [vmem:[%s6852_s26 + $0x28] sm:$0xff] %v3780_v61  ;;  %v3767_v4 = vmul.f32 %v3874_v32, %v3752_v55 }
 0x5b0   : > { %3787 = vst [vmem:[%s6852_s26 + $0x20] sm:$0xff] %v3779_v34  ;;  %v3766_v44 = vmul.f32 %v3874_v32, %v3751_v26 }
 0x5b1   : > { %v3782_v10 = vadd.f32 %v3875_v52, %v3767_v4 }
 0x5b2   : > { %v3781_v13 = vadd.f32 %v3875_v52, %v3766_v44 }
 0x5b3   : > { %3790 = vst [vmem:[%s6852_s26 + $0x38] sm:$0xff] %v3782_v10 }
 0x5b4   : > { %3789 = vst [vmem:[%s6852_s26 + $0x30] sm:$0xff] %v3781_v13 }
 0x5b5   : > { %5682 = shalt.err (!%p5679_p3)
}
 0x5b6   : > { %s5683_s11 = scalar_lea.hbm %s6869_s9, 1024  ;;  %s5687_s17 = scalar_lea.hbm %s6923_s5, 2048 }
 0x5b7   : > { %p5684_p4 = scmp.ne.s32.totalorder %s6869_s9, %s5683_s11  ;;  %p5688_p9 = scmp.lt.u32.totalorder %s6869_s9, %s6923_s5 }
 0x5b8   : > { %p5689_p10 = scmp.lt.u32.totalorder %s5687_s17, %s5683_s11  ;;  %p5691_p12 = scmp.lt.u32.totalorder %s5683_s11, %s6869_s9 }
 0x5b9   : > { %p5685_p7 = pnand %p5684_p4, %p5804_p5 }
 0x5ba   : > { %p5690_p11 = por %p5689_p10, %p5688_p9 }
 0x5bb   : > { %p5686_p8 = pneg %p5685_p7 }
 0x5bc   : > { %p5692_p13 = por %p5691_p12, %p5690_p11 }
 0x5be   : > { %p5693_p0 = pnand %p5692_p13, %p5686_p8 }
 0x5c0   : > { %5696 = shalt.err (!%p5693_p0)
}
 0x5c1   : > { %s5734_s26 = smov 128   ;;  %s5735_s30 = smov 8  }
 0x5c2   : > { %5612 = dma.vmem_to_hbm [thread:$0]  (%p5804_p5), %s6871_s6, 1024, %s6869_s9, %s6877_s22, %s5734_s26, %s5734_s26, %s5735_s30  }
 0x5c3 PF: > { %p5618_p1 = scmp.ge.s32.totalorder %s5731_s21, 2  ;;  %s3820_s7 = sand.u32 1, %s5719_s18  }
 0x5c4   : > { %s3821_s8 = scalar_lea.sflag [#allocation3], %s3820_s7 }
 0x5c5   : > { %p5615_p2 = pnand %p5618_p1, %p5808_p6 }
 0x5c7   : > { %5714 = dma.done.wait (!%p5615_p2), %s3821_s8, 1024  }
 0x5c8   : > { %5716 = vsyncadd (!%p5615_p2), %s3821_s8, 4294966272  ;;  %p15_p3 = scmp.ge.s32.totalorder %s5791_s24, 4   ;;  %s7053_s18 = smov %s5723_s19 }
 0x5c9   : > { %s7054_s19 = smov %s5727_s20  ;;  %s7055_s20 = smov %s5802_s27 }
 0x5ca   : > { %s7056_s21 = smov %s5791_s24  ;;  %17 = sbr.rel (!%p15_p3) target bundleno = 3 (0x3), region = 75 }
 0x5d1   :  { %3826 = vsyncpa [#allocation3], 1 }
 0x5d2   :  { %3828 = vsyncpa [#allocation3 + $0x1], 1 }

</bundles_post_ra>
